<compile_context>
chip_gen: v5e
topology: v5e:2x2
jax: 0.10.0
libtpu: 0.0.40
codegen_flags: <defaults>
</compile_context>

<pallas_src>
import jax
import jax.numpy as jnp
from jax.experimental import pallas as pl
from jax.experimental.pallas import tpu as pltpu

NUM_TYPES = 5
EMBED_DIM = 10                 # 7 numerical + 10 embedding = 17 = fc1 input dim
NUM_NUMERICAL = 7
NUM_IN = 1 + NUM_NUMERICAL     # type-id column + numerical columns
H1, H2, H_OUT = 64, 32, 1


def fraud_kernel(x_ref, w1t_ref, tt_ref, b1_ref, w2t_ref, b2_ref, w3t_ref,
                 b3_ref, o_ref):
    """One batch tile (batch on lanes); weights stay VMEM-resident."""
    xT = x_ref[...]                                          # (8, TB) f32
    idx = xT[0:1, :]                                         # (1, TB) f32 (integer valued)

    # fc1 numerical part: (64, 8)bf16 @ (8, TB)bf16 -> (64, TB)f32.
    # Column 0 of w1t is zeroed so the id column contributes nothing here.
    h1 = jnp.dot(w1t_ref[...], xT.astype(jnp.bfloat16),
                 preferred_element_type=jnp.float32)          # (64, TB)

    # Embedding contribution on the VPU: 5-way select, no one-hot matmul.
    tt = tt_ref[...]                                          # (64, NUM_TYPES) f32
    for t in range(NUM_TYPES):
        mask = (idx == float(t)).astype(jnp.float32)          # (1, TB)
        h1 = h1 + mask * tt[:, t:t + 1]                       # (64,1)*(1,TB) -> (64,TB)

    h1 = jnp.maximum(h1 + b1_ref[...], 0.0)                   # (64, TB) f32

    # fc2 -> relu
    h2 = jnp.dot(w2t_ref[...], h1.astype(jnp.bfloat16),
                 preferred_element_type=jnp.float32)
    h2 = jnp.maximum(h2 + b2_ref[...], 0.0)                   # (32, TB) f32

    # fc3 -> sigmoid (lane-dense (1, TB) store)
    logits = jnp.dot(w3t_ref[...], h2.astype(jnp.bfloat16),
                     preferred_element_type=jnp.float32) + b3_ref[...]
    o_ref[...] = jax.nn.sigmoid(logits)                       # (1, TB)


def fraud_forward(x, params, tb=512):
    """x: (B, 8) f32 — col 0 is the type index (as float), cols 1..7 numerical."""
    emb, w1, b1, w2, b2, w3, b3 = params
    B = x.shape[0]

    # Fold the embedding table into fc1 and pre-transpose everything (once).
    w8 = jnp.concatenate(
        [jnp.zeros((1, H1), w1.dtype), w1[:NUM_NUMERICAL, :]], axis=0)   # (8, 64)
    w1t = w8.T.astype(jnp.bfloat16)                                      # (64, 8)
    tt = jnp.dot(emb, w1[NUM_NUMERICAL:, :]).T                           # (64, 5) f32
    b1t = b1.reshape(1, H1).T                                            # (64, 1)
    w2t = w2.T.astype(jnp.bfloat16)                                      # (32, 64)
    b2t = b2.reshape(1, H2).T                                            # (32, 1)
    w3t = w3.T.astype(jnp.bfloat16)                                      # (1, 32)
    b3t = b3.reshape(1, H_OUT).T                                         # (1, 1)

    # Pad the batch to a multiple of the tile and go features-major.
    n_blocks = pl.cdiv(B, tb)
    b_pad = n_blocks * tb
    if b_pad != B:
        x = jnp.pad(x, ((0, b_pad - B), (0, 0)))   # padded rows: type id 0, zeros
    xT = x.T                                       # (8, b_pad)

    out = pl.pallas_call(
        fraud_kernel,
        out_shape=jax.ShapeDtypeStruct((H_OUT, b_pad), jnp.float32),
        grid=(n_blocks,),
        in_specs=[
            pl.BlockSpec((NUM_IN, tb), lambda i: (0, i)),     # streamed x tile
            pl.BlockSpec((H1, NUM_IN), lambda i: (0, 0)),     # resident weights
            pl.BlockSpec((H1, NUM_TYPES), lambda i: (0, 0)),
            pl.BlockSpec((H1, 1), lambda i: (0, 0)),
            pl.BlockSpec((H2, H1), lambda i: (0, 0)),
            pl.BlockSpec((H2, 1), lambda i: (0, 0)),
            pl.BlockSpec((H_OUT, H2), lambda i: (0, 0)),
            pl.BlockSpec((H_OUT, 1), lambda i: (0, 0)),
        ],
        out_specs=pl.BlockSpec((H_OUT, tb), lambda i: (0, i)),  # lane-dense output
        compiler_params=pltpu.CompilerParams(
            dimension_semantics=("parallel",),
        ),
    )(xT, w1t, tt, b1t, w2t, b2t, w3t, b3t)

    return out[0, :B][:, None]                                  # (B, 1)


def reference_forward(x, params):
    """Pure-JAX f32 reference mirroring the PyTorch forward."""
    emb, w1, b1, w2, b2, w3, b3 = params
    idx = x[:, 0].astype(jnp.int32)
    type_embedded = emb[idx]                                    # (B, EMBED_DIM)
    feats = jnp.concatenate([x[:, 1:1 + NUM_NUMERICAL], type_embedded], axis=1)
    h1 = jnp.maximum(feats @ w1 + b1, 0.0)
    h2 = jnp.maximum(h1 @ w2 + b2, 0.0)
    return jax.nn.sigmoid(h2 @ w3 + b3)


def init_params(key):
    ks = jax.random.split(key, 7)
    emb = 0.1 * jax.random.normal(ks[0], (NUM_TYPES, EMBED_DIM), jnp.float32)
    w1 = 0.1 * jax.random.normal(ks[1], (NUM_NUMERICAL + EMBED_DIM, H1), jnp.float32)
    b1 = 0.1 * jax.random.normal(ks[2], (1, H1), jnp.float32)
    w2 = 0.1 * jax.random.normal(ks[3], (H1, H2), jnp.float32)
    b2 = 0.1 * jax.random.normal(ks[4], (1, H2), jnp.float32)
    w3 = 0.1 * jax.random.normal(ks[5], (H2, H_OUT), jnp.float32)
    b3 = 0.1 * jax.random.normal(ks[6], (1, H_OUT), jnp.float32)
    return (emb, w1, b1, w2, b2, w3, b3)


if __name__ == "__main__":
    key = jax.random.PRNGKey(0)
    pkey, tkey, nkey = jax.random.split(key, 3)
    params = init_params(pkey)

    # Small demo batch; non-multiple of the tile size to exercise grid + padding.
    B = 2500
    type_ids = jax.random.randint(tkey, (B, 1), 0, NUM_TYPES).astype(jnp.float32)
    numerical = jax.random.normal(nkey, (B, NUM_NUMERICAL), jnp.float32)
    x = jnp.concatenate([type_ids, numerical], axis=1)         # (B, 8)

    out = jax.block_until_ready(fraud_forward(x, params, tb=512))
    ref = jax.block_until_ready(reference_forward(x, params))

    assert out.shape == (B, 1)
    # bf16 MXU operands => slightly looser tolerance than the f32 reference.
    assert jnp.allclose(out, ref, atol=2e-2, rtol=2e-2), (out, ref)
    print("KERNEL_OK")
</pallas_src>

<mosaic_0001>
module attributes {stable_mosaic.version = 11 : i64} {
  func.func @fraud_kernel(%arg0: i32, %arg1: memref<8x512xf32, #tpu.memory_space<vmem>>, %arg2: memref<64x8xbf16, #tpu.memory_space<vmem>>, %arg3: memref<64x5xf32, #tpu.memory_space<vmem>>, %arg4: memref<64x1xf32, #tpu.memory_space<vmem>>, %arg5: memref<32x64xbf16, #tpu.memory_space<vmem>>, %arg6: memref<32x1xf32, #tpu.memory_space<vmem>>, %arg7: memref<1x32xbf16, #tpu.memory_space<vmem>>, %arg8: memref<1x1xf32, #tpu.memory_space<vmem>>, %arg9: memref<1x512xf32, #tpu.memory_space<vmem>>) attributes {dimension_semantics = [#tpu.dimension_semantics<parallel>], iteration_bounds = array<i64: 5>, scalar_prefetch = 0 : i64, scratch_operands = 0 : i64, tpu.core_type = #tpu.core_type<tc>, window_params = [{transform_indices = @transform_0, window_bounds = array<i64: 8, 512>}, {pipeline_mode = #tpu.pipeline_mode<synchronous>, transform_indices = @transform_1, window_bounds = array<i64: 64, 8>}, {pipeline_mode = #tpu.pipeline_mode<synchronous>, transform_indices = @transform_2, window_bounds = array<i64: 64, 5>}, {pipeline_mode = #tpu.pipeline_mode<synchronous>, transform_indices = @transform_3, window_bounds = array<i64: 64, 1>}, {pipeline_mode = #tpu.pipeline_mode<synchronous>, transform_indices = @transform_4, window_bounds = array<i64: 32, 64>}, {pipeline_mode = #tpu.pipeline_mode<synchronous>, transform_indices = @transform_5, window_bounds = array<i64: 32, 1>}, {pipeline_mode = #tpu.pipeline_mode<synchronous>, transform_indices = @transform_6, window_bounds = array<i64: 1, 32>}, {pipeline_mode = #tpu.pipeline_mode<synchronous>, transform_indices = @transform_7, window_bounds = array<i64: 1, 1>}, {transform_indices = @transform_8, window_bounds = array<i64: 1, 512>}]} {
    %c0 = arith.constant 0 : index
    %c0_0 = arith.constant 0 : index
    %0 = vector.load %arg1[%c0, %c0_0] : memref<8x512xf32, #tpu.memory_space<vmem>>, vector<8x512xf32>
    %1 = vector.extract_strided_slice %0 {offsets = [0, 0], sizes = [1, 512], strides = [1, 1]} : vector<8x512xf32> to vector<1x512xf32>
    %c0_1 = arith.constant 0 : index
    %c0_2 = arith.constant 0 : index
    %2 = vector.load %arg2[%c0_1, %c0_2] : memref<64x8xbf16, #tpu.memory_space<vmem>>, vector<64x8xbf16>
    %3 = arith.truncf %0 : vector<8x512xf32> to vector<8x512xbf16>
    %cst = arith.constant dense<0.000000e+00> : vector<64x512xf32>
    %4 = tpu.matmul %2, %3, %cst {dimension_numbers = #tpu.dot_dimension_numbers<[1], [0], [0], [1], [0, 0, 1, 1], [], []>} : vector<64x8xbf16>, vector<8x512xbf16>, vector<64x512xf32> -> vector<64x512xf32>
    %c0_3 = arith.constant 0 : index
    %c0_4 = arith.constant 0 : index
    %5 = vector.load %arg3[%c0_3, %c0_4] : memref<64x5xf32, #tpu.memory_space<vmem>>, vector<64x5xf32>
    %cst_5 = arith.constant 0.000000e+00 : f32
    %6 = vector.broadcast %cst_5 : f32 to vector<1x512xf32>
    %7 = arith.cmpf oeq, %1, %6 : vector<1x512xf32>
    %8 = arith.extui %7 : vector<1x512xi1> to vector<1x512xi32>
    %9 = arith.sitofp %8 : vector<1x512xi32> to vector<1x512xf32>
    %10 = vector.extract_strided_slice %5 {offsets = [0, 0], sizes = [64, 1], strides = [1, 1]} : vector<64x5xf32> to vector<64x1xf32>
    %11 = vector.broadcast %9 : vector<1x512xf32> to vector<64x512xf32>
    %12 = vector.broadcast %10 : vector<64x1xf32> to vector<64x512xf32>
    %13 = arith.mulf %11, %12 : vector<64x512xf32>
    %14 = arith.addf %4, %13 : vector<64x512xf32>
    %cst_6 = arith.constant 1.000000e+00 : f32
    %15 = vector.broadcast %cst_6 : f32 to vector<1x512xf32>
    %16 = arith.cmpf oeq, %1, %15 : vector<1x512xf32>
    %17 = arith.extui %16 : vector<1x512xi1> to vector<1x512xi32>
    %18 = arith.sitofp %17 : vector<1x512xi32> to vector<1x512xf32>
    %19 = vector.extract_strided_slice %5 {offsets = [0, 1], sizes = [64, 1], strides = [1, 1]} : vector<64x5xf32> to vector<64x1xf32>
    %20 = vector.broadcast %18 : vector<1x512xf32> to vector<64x512xf32>
    %21 = vector.broadcast %19 : vector<64x1xf32> to vector<64x512xf32>
    %22 = arith.mulf %20, %21 : vector<64x512xf32>
    %23 = arith.addf %14, %22 : vector<64x512xf32>
    %cst_7 = arith.constant 2.000000e+00 : f32
    %24 = vector.broadcast %cst_7 : f32 to vector<1x512xf32>
    %25 = arith.cmpf oeq, %1, %24 : vector<1x512xf32>
    %26 = arith.extui %25 : vector<1x512xi1> to vector<1x512xi32>
    %27 = arith.sitofp %26 : vector<1x512xi32> to vector<1x512xf32>
    %28 = vector.extract_strided_slice %5 {offsets = [0, 2], sizes = [64, 1], strides = [1, 1]} : vector<64x5xf32> to vector<64x1xf32>
    %29 = vector.broadcast %27 : vector<1x512xf32> to vector<64x512xf32>
    %30 = vector.broadcast %28 : vector<64x1xf32> to vector<64x512xf32>
    %31 = arith.mulf %29, %30 : vector<64x512xf32>
    %32 = arith.addf %23, %31 : vector<64x512xf32>
    %cst_8 = arith.constant 3.000000e+00 : f32
    %33 = vector.broadcast %cst_8 : f32 to vector<1x512xf32>
    %34 = arith.cmpf oeq, %1, %33 : vector<1x512xf32>
    %35 = arith.extui %34 : vector<1x512xi1> to vector<1x512xi32>
    %36 = arith.sitofp %35 : vector<1x512xi32> to vector<1x512xf32>
    %37 = vector.extract_strided_slice %5 {offsets = [0, 3], sizes = [64, 1], strides = [1, 1]} : vector<64x5xf32> to vector<64x1xf32>
    %38 = vector.broadcast %36 : vector<1x512xf32> to vector<64x512xf32>
    %39 = vector.broadcast %37 : vector<64x1xf32> to vector<64x512xf32>
    %40 = arith.mulf %38, %39 : vector<64x512xf32>
    %41 = arith.addf %32, %40 : vector<64x512xf32>
    %cst_9 = arith.constant 4.000000e+00 : f32
    %42 = vector.broadcast %cst_9 : f32 to vector<1x512xf32>
    %43 = arith.cmpf oeq, %1, %42 : vector<1x512xf32>
    %44 = arith.extui %43 : vector<1x512xi1> to vector<1x512xi32>
    %45 = arith.sitofp %44 : vector<1x512xi32> to vector<1x512xf32>
    %46 = vector.extract_strided_slice %5 {offsets = [0, 4], sizes = [64, 1], strides = [1, 1]} : vector<64x5xf32> to vector<64x1xf32>
    %47 = vector.broadcast %45 : vector<1x512xf32> to vector<64x512xf32>
    %48 = vector.broadcast %46 : vector<64x1xf32> to vector<64x512xf32>
    %49 = arith.mulf %47, %48 : vector<64x512xf32>
    %50 = arith.addf %41, %49 : vector<64x512xf32>
    %c0_10 = arith.constant 0 : index
    %c0_11 = arith.constant 0 : index
    %51 = vector.load %arg4[%c0_10, %c0_11] : memref<64x1xf32, #tpu.memory_space<vmem>>, vector<64x1xf32>
    %52 = vector.broadcast %51 : vector<64x1xf32> to vector<64x512xf32>
    %53 = arith.addf %50, %52 : vector<64x512xf32>
    %cst_12 = arith.constant 0.000000e+00 : f32
    %54 = vector.broadcast %cst_12 : f32 to vector<64x512xf32>
    %55 = arith.maximumf %53, %54 : vector<64x512xf32>
    %c0_13 = arith.constant 0 : index
    %c0_14 = arith.constant 0 : index
    %56 = vector.load %arg5[%c0_13, %c0_14] : memref<32x64xbf16, #tpu.memory_space<vmem>>, vector<32x64xbf16>
    %57 = arith.truncf %55 : vector<64x512xf32> to vector<64x512xbf16>
    %cst_15 = arith.constant dense<0.000000e+00> : vector<32x512xf32>
    %58 = tpu.matmul %56, %57, %cst_15 {dimension_numbers = #tpu.dot_dimension_numbers<[1], [0], [0], [1], [0, 0, 1, 1], [], []>} : vector<32x64xbf16>, vector<64x512xbf16>, vector<32x512xf32> -> vector<32x512xf32>
    %c0_16 = arith.constant 0 : index
    %c0_17 = arith.constant 0 : index
    %59 = vector.load %arg6[%c0_16, %c0_17] : memref<32x1xf32, #tpu.memory_space<vmem>>, vector<32x1xf32>
    %60 = vector.broadcast %59 : vector<32x1xf32> to vector<32x512xf32>
    %61 = arith.addf %58, %60 : vector<32x512xf32>
    %cst_18 = arith.constant 0.000000e+00 : f32
    %62 = vector.broadcast %cst_18 : f32 to vector<32x512xf32>
    %63 = arith.maximumf %61, %62 : vector<32x512xf32>
    %c0_19 = arith.constant 0 : index
    %c0_20 = arith.constant 0 : index
    %64 = vector.load %arg7[%c0_19, %c0_20] : memref<1x32xbf16, #tpu.memory_space<vmem>>, vector<1x32xbf16>
    %65 = arith.truncf %63 : vector<32x512xf32> to vector<32x512xbf16>
    %cst_21 = arith.constant dense<0.000000e+00> : vector<1x512xf32>
    %66 = tpu.matmul %64, %65, %cst_21 {dimension_numbers = #tpu.dot_dimension_numbers<[1], [0], [0], [1], [0, 0, 1, 1], [], []>} : vector<1x32xbf16>, vector<32x512xbf16>, vector<1x512xf32> -> vector<1x512xf32>
    %c0_22 = arith.constant 0 : index
    %c0_23 = arith.constant 0 : index
    %67 = vector.load %arg8[%c0_22, %c0_23] : memref<1x1xf32, #tpu.memory_space<vmem>>, vector<1x1xf32>
    %68 = vector.broadcast %67 : vector<1x1xf32> to vector<1x512xf32>
    %69 = arith.addf %66, %68 : vector<1x512xf32>
    %70 = arith.negf %69 : vector<1x512xf32>
    %71 = math.exp %70 : vector<1x512xf32>
    %cst_24 = arith.constant 1.000000e+00 : f32
    %72 = vector.broadcast %cst_24 : f32 to vector<1x512xf32>
    %73 = arith.addf %72, %71 : vector<1x512xf32>
    %74 = arith.divf %72, %73 : vector<1x512xf32>
    %c0_25 = arith.constant 0 : index
    %c0_26 = arith.constant 0 : index
    %75 = vector.load %arg9[%c0_25, %c0_26] : memref<1x512xf32, #tpu.memory_space<vmem>>, vector<1x512xf32>
    tpu.vector_store %arg9[%c0_25, %c0_26], %74 {strides = array<i32>} : memref<1x512xf32, #tpu.memory_space<vmem>>, vector<1x512xf32>,
    return
  }
  func.func @transform_0(%arg0: i32) -> (i32, i32) {
    %c0_i32 = arith.constant 0 : i32
    %c0_i32_0 = arith.constant 0 : i32
    return %c0_i32, %arg0 : i32, i32
  }
  func.func @transform_1(%arg0: i32) -> (i32, i32) {
    %c0_i32 = arith.constant 0 : i32
    %c0_i32_0 = arith.constant 0 : i32
    %c0_i32_1 = arith.constant 0 : i32
    return %c0_i32, %c0_i32_0 : i32, i32
  }
  func.func @transform_2(%arg0: i32) -> (i32, i32) {
    %c0_i32 = arith.constant 0 : i32
    %c0_i32_0 = arith.constant 0 : i32
    %c0_i32_1 = arith.constant 0 : i32
    return %c0_i32, %c0_i32_0 : i32, i32
  }
  func.func @transform_3(%arg0: i32) -> (i32, i32) {
    %c0_i32 = arith.constant 0 : i32
    %c0_i32_0 = arith.constant 0 : i32
    %c0_i32_1 = arith.constant 0 : i32
    return %c0_i32, %c0_i32_0 : i32, i32
  }
  func.func @transform_4(%arg0: i32) -> (i32, i32) {
    %c0_i32 = arith.constant 0 : i32
    %c0_i32_0 = arith.constant 0 : i32
    %c0_i32_1 = arith.constant 0 : i32
    return %c0_i32, %c0_i32_0 : i32, i32
  }
  func.func @transform_5(%arg0: i32) -> (i32, i32) {
    %c0_i32 = arith.constant 0 : i32
    %c0_i32_0 = arith.constant 0 : i32
    %c0_i32_1 = arith.constant 0 : i32
    return %c0_i32, %c0_i32_0 : i32, i32
  }
  func.func @transform_6(%arg0: i32) -> (i32, i32) {
    %c0_i32 = arith.constant 0 : i32
    %c0_i32_0 = arith.constant 0 : i32
    %c0_i32_1 = arith.constant 0 : i32
    return %c0_i32, %c0_i32_0 : i32, i32
  }
  func.func @transform_7(%arg0: i32) -> (i32, i32) {
    %c0_i32 = arith.constant 0 : i32
    %c0_i32_0 = arith.constant 0 : i32
    %c0_i32_1 = arith.constant 0 : i32
    return %c0_i32, %c0_i32_0 : i32, i32
  }
  func.func @transform_8(%arg0: i32) -> (i32, i32) {
    %c0_i32 = arith.constant 0 : i32
    %c0_i32_0 = arith.constant 0 : i32
    return %c0_i32, %arg0 : i32, i32
  }
}

</mosaic_0001>

<bundles_post_ra>
// kernel: tpu_custom_call.1
= control target key start
LH: loop header
LB: loop body
LE: loop exit
PB: predicated region body
PF: predicated region fallthrough
CT: control target
= control target key end

     0   :  { %s3012_s0 = inlined_call_operand.hbm [shape: f32[8,2560], index: 0, kind: input, shape index: {}]   ;;  %s3013_s1 = inlined_call_operand.vmem [shape: bf16[64,8], index: 1, kind: input, shape index: {}]   ;;  %s3014_s2 = inlined_call_operand.vmem [shape: f32[64,5], index: 2, kind: input, shape index: {}]   ;;  %s3015_s3 = inlined_call_operand.vmem [shape: f32[64,1], index: 3, kind: input, shape index: {}]   ;;  %s3016_s4 = inlined_call_operand.vmem [shape: bf16[32,64], index: 4, kind: input, shape index: {}]   ;;  %s3017_s5 = inlined_call_operand.vmem [shape: f32[32,1], index: 5, kind: input, shape index: {}]   ;;  %s3018_s6 = inlined_call_operand.vmem [shape: bf16[1,32], index: 6, kind: input, shape index: {}]   ;;  %s3019_s7 = inlined_call_operand.<no memory space> [shape: f32[1,1], index: 7, kind: input, shape index: {}]   ;;  %s3020_s8 = inlined_call_operand.hbm [shape: f32[1,2560], index: 8, kind: output, shape index: {}]  }
   0x1   :  { %v13_v0 = vstv %s3019_s7 }
   0x2   :  { %14 = vst [vmem:[#allocation2] sm:$0x1] %v13_v0 }
   0x3   :  { %15 = vsyncpa [#allocation4], 0 }
   0x4   :  { %17 = vsyncpa [#allocation4 + $0x1], 0 }
   0x5   :  { %18 = vsyncpa [#allocation5], 0 }
   0x6   :  { %20 = vsyncpa [#allocation5 + $0x1], 0  ;;  %s1925_s29 = smov 0   ;;  %s1927_s30 = smov 0  }
   0x7   :  { %s1929_s9 = smov 0   ;;  %s1931_s10 = smov 0  }
   0x8 LB: > { %s1946_s7 = sadd.s32 4294967295, %s1869_s10   ;;  %s1569_s11 = sadd.s32 4294967294, %s1869_s10   ;;  %s1869_s10 = sphi %s1931_s10, %s3178_s10   ;;  %s1865_s9 = sphi %s1929_s9, %s3177_s9   ;;  %s1861_s30 = sphi %s1927_s30, %s3176_s30   ;;  %s1857_s29 = sphi %s1925_s29, %s3175_s29  }
   0x9   : > { %s1950_s12 = sadd.s32 1, %s1869_s10   ;;  %s33_s13 = sadd.s32 1, %s1865_s9 }
   0xa   : > { %s30_s14 = ssub.s32 %s1869_s10, %s1950_s12  ;;  %p40_p0 = scmp.ne.s32.totalorder %s1865_s9, %s1861_s30 }
   0xb   : > { %p31_p1 = scmp.eq.s32.totalorder %s30_s14, 0  ;;  %p41_p2 = scmp.eq.s32.totalorder %s1869_s10, 0 }
   0xc   : > { %p46_p3 = scmp.ne.s32.totalorder %s1861_s30, %s1857_s29  ;;  %p47_p4 = scmp.eq.s32.totalorder %s1946_s7, 0 }
   0xd   : > { %s1962_s15 = scalar_select %p31_p1, %s1865_s9, %s33_s13  }
   0xe   : > { %p1964_p5 = por %p41_p2, %p40_p0  ;;  %p1968_p6 = por %p47_p4, %p46_p3 }
   0xf   : > { %3035 = sst [smem:[#allocation9_spill]] %s1962_s15  ;;  %p217_p7 = scmp.eq.s32.totalorder %s1946_s7, 4 }
  0x10   : > { %p223_p8 = scmp.eq.s32.totalorder %s1569_s11, 4  ;;  %p1677_p9 = scmp.lt.s32.totalorder %s1869_s10, 5 }
  0x11   : > { %p1974_p10 = por %p217_p7, %p40_p0  ;;  %s264_s20 = sand.u32 1, %s1865_s9  }
  0x12   : > { %p1978_p11 = por %p223_p8, %p46_p3  ;;  %s1658_s21 = sshll.u32 %s1869_s10, 5 }
  0x13   : > { %s1572_s22 = sshll.u32 %s264_s20, 5  ;;  %s273_s25 = scalar_lea.hbm %s3012_s0, %s1658_s21 }
  0x14   : > { %s275_s26 = sshll.u32 %s273_s25, 4  ;;  %s268_s27 = scalar_lea.vmem [#allocation3], %s1572_s22  ;;  %s276_s26 = int_to_ptr.hbm [resolvable:$true] %s275_s26 }
  0x15   : > { %s277_s28 = sshll.u32 %s268_s27, 4  ;;  %p1989_p12 = pnand %p1677_p9, %p1964_p5  ;;  %s278_s28 = int_to_ptr.vmem [resolvable:$true] %s277_s28 }
  0x16   : > { %p1575_p13 = scmp.ge.s32.totalorder %s1869_s10, 1  ;;  %p282_p0 = scmp.lt.s32.totalorder %s1869_s10, 6 }
  0x17   : > { %s265_s13 = scalar_lea.sflag [#allocation4], %s264_s20  ;;  %s1773_s14 = sshra.s32 %s276_s26, 4  ;;  %s1774_s14 = int_to_ptr.hbm [resolvable:$true] %s1773_s14 }
  0x18   : > { %s1775_s15 = scalar_lea.hbm %s1774_s14, 32  ;;  %p1777_p2 = pneg %p1989_p12 }
  0x19   : > { %p1776_p1 = scmp.ne.s32.totalorder %s1774_s14, %s1775_s15  ;;  %s1780_s16 = scalar_lea.hbm %s3012_s0, 160 }
  0x1a   : > { %p1781_p5 = scmp.lt.s32.totalorder %s1774_s14, %s3012_s0  ;;  %p1782_p7 = scmp.lt.s32.totalorder %s1780_s16, %s1775_s15 }
  0x1b   : > { %p1778_p3 = pnand %p1777_p2, %p1776_p1 }
  0x1c   : > { %p1783_p8 = por %p1782_p7, %p1781_p5 }
  0x1d   : > { %p1779_p4 = pneg %p1778_p3 }
  0x1f   : > { %p1784_p9 = pnand %p1783_p8, %p1779_p4 }
  0x21   : > { %1787 = shalt.err (!%p1784_p9)
}
  0x22   : > { %1672 = dma.hbm_to_vmem [thread:$0]  (!%p1989_p12), %s276_s26, 512, %s278_s28, %s265_s13  }
  0x23   : > { %p283_p1 = pnand %p1575_p13, %p282_p0 }
  0x25   : > { %286 = sbr.rel (%p283_p1) target bundleno = 673 (0x2a1), region = 52 }
  0x2a   : > { %s2010_s20 = sand.u32 1, %s1861_s30  }
  0x2b   : > { %s1576_s25 = sshll.u32 %s2010_s20, 5  ;;  %s289_s15 = scalar_lea.sflag [#allocation4], %s2010_s20 }
  0x2c   : > { %s2014_s27 = scalar_lea.vmem [#allocation3], %s1576_s25 }
  0x2d   : > { %1848 = dma.done.wait (%p1968_p6), %s289_s15, 512  }
  0x2e   : > { %1850 = vsyncadd (%p1968_p6), %s289_s15, 4294966784  ;;  %v1871_v1 = vmov 1   ;;  %v3023_v2 = vmov 0   ;;  %v351_v3 = vld [vmem:[%s3014_s2 + $0x30] sm:$0xff]  ;;  %v2029_v4 = vld [vmem:[%s3014_s2 + $0x20] sm:$0xff]  ;;  %vm474_vm0 = vcmask 1043456  }
  0x2f   : > { %1718 = vset.pattern.permute.xlu1 %v1871_v1  ;;  %1719 = vset.pattern.permute.xlu2 %v3023_v2  ;;  %v2032_v5 = vld [vmem:[%s2014_s27] sm:$0xff]  ;;  %v2037_v7 = vld [vmem:[%s2014_s27 + $0x8] sm:$0xff]  ;;  %vm461_vm1 = vcmask 64512   ;;  %v2047_v11 = vld [vmem:[%s2014_s27 + $0x10] sm:$0xff]  ;;  %v1873_v20 = vmov 2   ;;  %v1874_v23 = vmov 3  }
  0x30   : > { %1717 = vset.pattern.permute.xlu0 %v3023_v2  ;;  %644 = vperm.xlu1 %1718, %v351_v3   ;;  %v341_v6 = vpack.c.bf16 %v2032_v5, %v2032_v5  ;;  %v1659_v9 = vld [vmem:[%s3013_s1] sm:$0xff]  ;;  %v342_v10 = vpack.c.bf16 %v2037_v7, %v2037_v7  ;;  %v2053_v13 = vld [vmem:[%s3014_s2 + $0x38] sm:$0xff]  ;;  %v2059_v14 = vld [vmem:[%s3014_s2 + $0x28] sm:$0xff]  ;;  %v343_v15 = vpack.c.bf16 %v2047_v11, %v2047_v11  ;;  %v3025_v27 = vmov 4   ;;  %s1577_s15 = sshll.u32 %s2010_s20, 2  ;;  %s1484_s14 = scalar_lea.sflag [#allocation5], %s2010_s20 }
  0x31   : > { %401 = vperm.xlu0 %1717, %v351_v3   ;;  %391 = vperm.xlu2 %1719, %v2029_v4   ;;  %v2067_v17 = vld [vmem:[%s2014_s27 + $0x18] sm:$0xff]  ;;  %v1660_v21 = vld [vmem:[%s3013_s1 + $0x8] sm:$0xff]  ;;  %v2100_v24 = vld [vmem:[%s3014_s2 + $0x10] sm:$0xff]  ;;  %vm353_vm2 = vcmp.eq.f32.partialorder %v2032_v5, 0.0  ;;  %vm354_vm3 = vcmp.eq.f32.partialorder %v2037_v7, 0.0  ;;  %vm355_vm4 = vcmp.eq.f32.partialorder %v2047_v11, 0.0 }
  0x32   : > { %v476_v8 = vsel %vm474_vm0, %v341_v6, 0  ;;  %v479_v12 = vsel %vm474_vm0, %v342_v10, 0  ;;  %v482_v16 = vsel %vm474_vm0, %v343_v15, 0  ;;  %v344_v18 = vpack.c.bf16 %v2067_v17, %v2067_v17  ;;  %v2088_v22 = vld [vmem:[%s3014_s2 + $0x8] sm:$0xff]  ;;  %v2107_v25 = vld [vmem:[%s3014_s2 + $0x18] sm:$0xff]  ;;  %v1661_v26 = vld [vmem:[%s3013_s1 + $0x10] sm:$0xff] }
  0x33   : > { %494 = vmatpush.bf16.msra.mxu0 %v476_v8  ;;  %523 = vmatpush.bf16.msra.mxu1 %v479_v12  ;;  %v1662_v28 = vld [vmem:[%s3013_s1 + $0x18] sm:$0xff]  ;;  %v2147_v29 = vld [vmem:[%s3014_s2] sm:$0xff]  ;;  %v1057_v30 = vld [vmem:[%s3015_s3 + $0x30] sm:$0xff]  ;;  %vm356_vm5 = vcmp.eq.f32.partialorder %v2067_v17, 0.0  ;;  %v3021_v32 = vmov 0.0   ;;  %vm603_vm6 = vcmp.eq.f32.partialorder %v2032_v5, 1.0 }
  0x34   : > { %552 = vmatpush.bf16.msra.mxu2 %v482_v16  ;;  %v485_v19 = vsel %vm474_vm0, %v344_v18, 0  ;;  %v1578_v33 = vsel %vm353_vm2, 1.0, %v3021_v32  ;;  %v1579_v34 = vsel %vm354_vm3, 1.0, %v3021_v32  ;;  %v1580_v35 = vsel %vm355_vm4, 1.0, %v3021_v32  ;;  %v1058_v41 = vld [vmem:[%s3015_s3 + $0x38] sm:$0xff]  ;;  %v1055_v18 = vld [vmem:[%s3015_s3 + $0x20] sm:$0xff] }
  0x35   : > { %581 = vmatpush.bf16.msra.mxu3 %v485_v19  ;;  %v1581_v36 = vsel %vm356_vm5, 1.0, %v3021_v32  ;;  %v2173_v37 = vperm.slane %v1578_v33, 0  ;;  %v2175_v38 = vperm.slane %v1579_v34, 0  ;;  %v2177_v39 = vperm.slane %v1580_v35, 0  ;;  %s1655_s27 = sshll.u32 %s1946_s7, 2  ;;  %s325_s11 = scalar_lea.vmem [#allocation6], %s1577_s15 }
  0x36   : > { %1598 = vmatmul.msk.bf16.vlgmr.msra.gmra.mxu0 %vm461_vm1, %v1659_v9  ;;  %1602 = vmatmul.msk.bf16.vlgmr.msra.gmra.mxu1 %vm461_vm1, %v1659_v9  ;;  %v2179_v40 = vperm.slane %v1581_v36, 0  ;;  %vm604_vm7 = vcmp.eq.f32.partialorder %v2037_v7, 1.0  ;;  %vm605_vm8 = vcmp.eq.f32.partialorder %v2047_v11, 1.0  ;;  %vm606_vm9 = vcmp.eq.f32.partialorder %v2067_v17, 1.0  ;;  %s1494_s28 = scalar_lea.hbm %s3020_s8, %s1655_s27  ;;  %s1496_s13 = sshll.u32 %s325_s11, 4  ;;  %s1497_s13 = int_to_ptr.vmem [resolvable:$true] %s1496_s13 }
  0x37   : > { %1606 = vmatmul.msk.bf16.vlgmr.msra.gmra.mxu2 %vm461_vm1, %v1659_v9  ;;  %v1614_v51 = vsel %vm603_vm6, 1.0, %v3021_v32  ;;  %v1615_v52 = vsel %vm604_vm7, 1.0, %v3021_v32  ;;  %v1616_v53 = vsel %vm605_vm8, 1.0, %v3021_v32  ;;  %v1617_v54 = vsel %vm606_vm9, 1.0, %v3021_v32  ;;  %s1498_s17 = sshll.u32 %s1494_s28, 4  ;;  %s1823_s24 = scalar_lea.hbm %s3020_s8, 20  ;;  %s1499_s17 = int_to_ptr.hbm [resolvable:$true] %s1498_s17 }
  0x38   : > { %648 = vperm.xlu1 %1718, %v2053_v13   ;;  %1610 = vmatmul.msk.bf16.vlgmr.msra.gmra.mxu3 %vm461_vm1, %v1659_v9  ;;  %v2223_v56 = vperm.slane %v1614_v51, 0  ;;  %v2225_v57 = vperm.slane %v1615_v52, 0  ;;  %v2227_v58 = vperm.slane %v1616_v53, 0  ;;  %v2229_v59 = vperm.slane %v1617_v54, 0  ;;  %v1056_v53 = vld [vmem:[%s3015_s3 + $0x28] sm:$0xff]  ;;  %s1817_s21 = sshra.s32 %s1499_s17, 4  ;;  %s1818_s21 = int_to_ptr.hbm [resolvable:$true] %s1817_s21 }
  0x39   : > { %406 = vperm.xlu0 %1717, %v2053_v13   ;;  %396 = vperm.xlu2 %1719, %v2059_v14   ;;  %vm715_vm10 = vcmp.eq.f32.partialorder %v2032_v5, 2.0  ;;  %vm716_vm11 = vcmp.eq.f32.partialorder %v2037_v7, 2.0  ;;  %vm717_vm12 = vcmp.eq.f32.partialorder %v2047_v11, 2.0  ;;  %vm718_vm13 = vcmp.eq.f32.partialorder %v2067_v17, 2.0  ;;  %s1819_s22 = scalar_lea.hbm %s1818_s21, 4  ;;  %p1824_p0 = scmp.lt.s32.totalorder %s1818_s21, %s3020_s8 }
  0x3a   : > { %v1618_v19 = vsel %vm715_vm10, 1.0, %v3021_v32  ;;  %vm827_vm14 = vcmp.eq.f32.partialorder %v2032_v5, 3.0  ;;  %vm828_vm15 = vcmp.eq.f32.partialorder %v2037_v7, 3.0  ;;  %vm829_vm0 = vcmp.eq.f32.partialorder %v2047_v11, 3.0  ;;  %p1820_p6 = scmp.ne.s32.totalorder %s1818_s21, %s1819_s22  ;;  %p1825_p2 = scmp.lt.s32.totalorder %s1823_s24, %s1819_s22 }
  0x3b   : > { %vm939_vm2 = vcmp.eq.f32.partialorder %v2032_v5, 4.0  ;;  %vm940_vm3 = vcmp.eq.f32.partialorder %v2037_v7, 4.0  ;;  %vm941_vm4 = vcmp.eq.f32.partialorder %v2047_v11, 4.0  ;;  %vm942_vm5 = vcmp.eq.f32.partialorder %v2067_v17, 4.0 }
  0x3c   : > { %vm1217_vm6 = vcmask 523264   ;;  %vm1332_vm7 = vcmask 261120   ;;  %p1821_p12 = pnand %p1820_p6, %p1974_p10  ;;  %p1826_p3 = por %p1825_p2, %p1824_p0 }
  0x3e   : > { %p1822_p13 = pneg %p1821_p12 }
  0x40   : > { %1721 = vset.pattern.permute.xlu1 %v1873_v20  ;;  %p1827_p4 = pnand %p1826_p3, %p1822_p13 }
  0x41   : > { %1720 = vset.pattern.permute.xlu0 %v1873_v20  ;;  %1722 = vset.pattern.permute.xlu2 %v1871_v1 }
  0x42   : > { %760 = vperm.xlu1 %1721, %v2053_v13   ;;  %756 = vperm.xlu0 %1720, %v351_v3  }
  0x43   : > { %636 = vperm.xlu2 %1722, %v2029_v4  }
  0x46   : > { %1599 = vmatmul.msk.bf16.gmra.mxu0 %vm461_vm1, %v1660_v21  ;;  %1603 = vmatmul.msk.bf16.gmra.mxu1 %vm461_vm1, %v1660_v21 }
  0x47   : > { %1607 = vmatmul.msk.bf16.gmra.mxu2 %vm461_vm1, %v1660_v21 }
  0x48   : > { %1611 = vmatmul.msk.bf16.gmra.mxu3 %vm461_vm1, %v1660_v21  ;;  %v1620_v21 = vsel %vm717_vm12, 1.0, %v3021_v32 }
  0x49   : > { %v2298_v33 = vperm.slane %v1620_v21, 0 }
  0x4a   : > { %1723 = vset.pattern.permute.xlu1 %v1871_v1  ;;  %1741 = vset.pattern.permute.xlu0 %v1871_v1 }
  0x4b   : > { %640 = vperm.xlu1 %1723, %v2059_v14   ;;  %1724 = vset.pattern.permute.xlu2 %v1874_v23 }
  0x4c   : > { %624 = vperm.xlu0 %1741, %v2088_v22   ;;  %868 = vperm.xlu2 %1724, %v351_v3  }
  0x53   : > { %1725 = vset.pattern.permute.xlu1 %v3023_v2 }
  0x54   : > { %1742 = vset.pattern.permute.xlu0 %v3025_v27  ;;  %381 = vperm.xlu1 %1725, %v2100_v24  }
  0x55   : > { %1726 = vset.pattern.permute.xlu2 %v3023_v2  ;;  %980 = vperm.xlu0 %1742, %v351_v3  }
  0x56   : > { %386 = vperm.xlu2 %1726, %v2107_v25   ;;  %1600 = vmatmul.msk.bf16.gmra.mxu0 %vm461_vm1, %v1661_v26 }
  0x57   : > { %1604 = vmatmul.msk.bf16.gmra.mxu1 %vm461_vm1, %v1661_v26  ;;  %1608 = vmatmul.msk.bf16.gmra.mxu2 %vm461_vm1, %v1661_v26 }
  0x58   : > { %1612 = vmatmul.msk.bf16.gmra.mxu3 %vm461_vm1, %v1661_v26  ;;  %v1051_v26 = vld [vmem:[%s3015_s3] sm:$0xff] }
  0x5c   : > { %1727 = vset.pattern.permute.xlu1 %v1873_v20 }
  0x5d   : > { %972 = vperm.xlu0 %1742, %v2029_v4   ;;  %748 = vperm.xlu1 %1727, %v2029_v4  }
  0x5e   : > { %1728 = vset.pattern.permute.xlu2 %v1873_v20 }
  0x5f   : > { %752 = vperm.xlu2 %1728, %v2059_v14  }
  0x65   : > { %964 = vperm.xlu0 %1742, %v2100_v24   ;;  %1729 = vset.pattern.permute.xlu1 %v3025_v27 }
  0x66   : > { %984 = vperm.xlu1 %1729, %v2053_v13   ;;  %1601 = vmatmul.msk.bf16.gmra.mxu0 %vm461_vm1, %v1662_v28 }
  0x67   : > { %1730 = vset.pattern.permute.xlu2 %v1871_v1  ;;  %1605 = vmatmul.msk.bf16.gmra.mxu1 %vm461_vm1, %v1662_v28 }
  0x68   : > { %628 = vperm.xlu2 %1730, %v2100_v24   ;;  %1609 = vmatmul.msk.bf16.gmra.mxu2 %vm461_vm1, %v1662_v28 }
  0x69   : > { %1613 = vmatmul.msk.bf16.gmra.mxu3 %vm461_vm1, %v1662_v28  ;;  %vm830_vm1 = vcmp.eq.f32.partialorder %v2067_v17, 3.0 }
  0x6d   : > { %1747 = vset.pattern.permute.xlu0 %v1874_v23 }
  0x6e   : > { %872 = vperm.xlu0 %1747, %v2053_v13   ;;  %1731 = vset.pattern.permute.xlu1 %v1871_v1 }
  0x6f   : > { %632 = vperm.xlu1 %1731, %v2107_v25  }
  0x70   : > { %1732 = vset.pattern.permute.xlu2 %v1874_v23 }
  0x71   : > { %860 = vperm.xlu2 %1732, %v2029_v4  }
  0x76   : > { %864 = vperm.xlu0 %1747, %v2059_v14  }
  0x77   : > { %1733 = vset.pattern.permute.xlu1 %v3023_v2 }
  0x78   : > { %371 = vperm.xlu1 %1733, %v2147_v29  }
  0x79   : > { %1734 = vset.pattern.permute.xlu2 %v3023_v2 }
  0x7a   : > { %376 = vperm.xlu2 %1734, %v2088_v22  }
  0x7e   : > { %848 = vperm.xlu0 %1747, %v2088_v22  }
  0x80   : > { %1735 = vset.pattern.permute.xlu1 %v1873_v20 }
  0x81   : > { %740 = vperm.xlu1 %1735, %v2100_v24  }
  0x82   : > { %1736 = vset.pattern.permute.xlu2 %v1873_v20 }
  0x83   : > { %744 = vperm.xlu2 %1736, %v2107_v25  }
  0x86   : > { %1756 = vset.pattern.permute.xlu0 %v3023_v2 }
  0x87   : > { %1061 = vperm.xlu0 %1756, %v1051_v26  }
  0x89   : > { %1737 = vset.pattern.permute.xlu1 %v3025_v27 }
  0x8a   : > { %976 = vperm.xlu1 %1737, %v2059_v14  }
  0x8b   : > { %1738 = vset.pattern.permute.xlu2 %v3023_v2  ;;  %v392_v31 = vpop.permute.xlu2 %391 }
  0x8c   : > { %1091 = vperm.xlu2 %1738, %v1057_v30   ;;  %v2187_v43 = vmul.f32 %v392_v31, %v2173_v37  ;;  %v2190_v44 = vmul.f32 %v392_v31, %v2175_v38  ;;  %v2193_v45 = vmul.f32 %v392_v31, %v2177_v39  ;;  %v2197_v46 = vmul.f32 %v392_v31, %v2179_v40 }
  0x8d   : > { %v2294_v30 = vperm.slane %v1618_v19, 0 }
  0x8e   : > { %3041 = vst [vmem:[#allocation10_spill] sm:$0xff] %v2197_v46 }
  0x92   : > { %1739 = vset.pattern.permute.xlu1 %v3023_v2 }
  0x93   : > { %1096 = vperm.xlu1 %1739, %v1058_v41   ;;  %v397_v42 = vpop.permute.xlu2 %396 }
  0x94   : > { %1740 = vset.pattern.permute.xlu2 %v1871_v1  ;;  %v2200_v47 = vmul.f32 %v397_v42, %v2173_v37  ;;  %v2203_v48 = vmul.f32 %v397_v42, %v2175_v38  ;;  %v2206_v49 = vmul.f32 %v397_v42, %v2177_v39  ;;  %v2209_v50 = vmul.f32 %v397_v42, %v2179_v40 }
  0x95   : > { %620 = vperm.xlu2 %1740, %v2147_v29  }
  0x96   : > { %3042 = vst [vmem:[#allocation11_spill] sm:$0xff] %v2206_v49  ;;  %v3069_v49 = vmov 0.0  }
  0x97   : > { %3043 = vst [vmem:[#allocation12_spill] sm:$0xff] %v2209_v50  ;;  %v1626_v46 = vsel %vm939_vm2, 1.0, %v3069_v49 }
  0x9b   : > { %1743 = vset.pattern.permute.xlu1 %v1874_v23 }
  0x9c   : > { %852 = vperm.xlu1 %1743, %v2100_v24   ;;  %v1621_v24 = vsel %vm718_vm13, 1.0, %v3021_v32  ;;  %vm1471_vm13 = vcmask 1040384  }
  0x9d   : > { %1744 = vset.pattern.permute.xlu2 %v1874_v23  ;;  %v637_v55 = vpop.permute.xlu2 %636  ;;  %v2300_v34 = vperm.slane %v1621_v24, 0 }
  0x9e   : > { %856 = vperm.xlu2 %1744, %v2107_v25   ;;  %v2247_v3 = vmul.f32 %v637_v55, %v2223_v56  ;;  %v2250_v4 = vmul.f32 %v637_v55, %v2225_v57  ;;  %v2253_v6 = vmul.f32 %v637_v55, %v2227_v58  ;;  %v2256_v8 = vmul.f32 %v637_v55, %v2229_v59 }
  0xa0   : > { %3048 = vst [vmem:[#allocation17_spill] sm:$0xff] %v2253_v6 }
  0xa1   : > { %3049 = vst [vmem:[#allocation18_spill] sm:$0xff] %v2256_v8  ;;  %v1623_v8 = vsel %vm828_vm15, 1.0, %v3069_v49 }
  0xa2   : > { %v645_v60 = vpop.permute.xlu1 %644  ;;  %v2447_v6 = vperm.slane %v1623_v8, 0 }
  0xa3   : > { %v2231_v61 = vpop.permute.xlu0 %401  ;;  %v2234_v62 = vmul.f32 %v645_v60, %v2223_v56  ;;  %v2237_v63 = vmul.f32 %v645_v60, %v2225_v57  ;;  %v2240_v0 = vmul.f32 %v645_v60, %v2227_v58  ;;  %v2243_v1 = vmul.f32 %v645_v60, %v2229_v59 }
  0xa4   : > { %1745 = vset.pattern.permute.xlu1 %v1873_v20  ;;  %3073 = vst [vmem:[#allocation39_spill] sm:$0xff] %v2447_v6 }
  0xa5   : > { %3044 = vst [vmem:[#allocation13_spill] sm:$0xff] %v2234_v62  ;;  %732 = vperm.xlu1 %1745, %v2147_v29   ;;  %v1624_v62 = vsel %vm829_vm0, 1.0, %v3069_v49 }
  0xa6   : > { %3045 = vst [vmem:[#allocation14_spill] sm:$0xff] %v2237_v63  ;;  %1746 = vset.pattern.permute.xlu2 %v1873_v20  ;;  %v2261_v9 = vpop.permute.xlu2 %868  ;;  %v1619_v20 = vsel %vm716_vm11, 1.0, %v3021_v32  ;;  %v3068_v63 = vmov 0  }
  0xa7   : > { %3046 = vst [vmem:[#allocation15_spill] sm:$0xff] %v2240_v0  ;;  %736 = vperm.xlu2 %1746, %v2088_v22   ;;  %v2296_v31 = vperm.slane %v1619_v20, 0  ;;  %v1184_v20 = vld [vmem:[%s3017_s5 + $0x8] sm:$0xff] }
  0xa8   : > { %3047 = vst [vmem:[#allocation16_spill] sm:$0xff] %v2243_v1  ;;  %1194 = vperm.xlu0 %1756, %v1184_v20   ;;  %v3065_v1 = vmov 4  }
  0xaa   : > { %v649_v10 = vpop.permute.xlu1 %648 }
  0xab   : > { %v2267_v12 = vpop.permute.xlu0 %406  ;;  %v2270_v13 = vmul.f32 %v649_v10, %v2223_v56  ;;  %v2273_v14 = vmul.f32 %v649_v10, %v2225_v57  ;;  %v2276_v15 = vmul.f32 %v649_v10, %v2227_v58  ;;  %v2279_v16 = vmul.f32 %v649_v10, %v2229_v59 }
  0xad   : > { %3050 = vst [vmem:[#allocation19_spill] sm:$0xff] %v2270_v13  ;;  %1748 = vset.pattern.permute.xlu1 %v3025_v27 }
  0xae   : > { %3051 = vst [vmem:[#allocation20_spill] sm:$0xff] %v2273_v14  ;;  %968 = vperm.xlu1 %1748, %v2107_v25  }
  0xaf   : > { %3052 = vst [vmem:[#allocation21_spill] sm:$0xff] %v2276_v15  ;;  %1749 = vset.pattern.permute.xlu2 %v3023_v2 }
  0xb0   : > { %3053 = vst [vmem:[#allocation22_spill] sm:$0xff] %v2279_v16  ;;  %1081 = vperm.xlu2 %1749, %v1055_v18   ;;  %v387_v28 = vpop.permute.xlu2 %386 }
  0xb1   : > { %v2325_v55 = vmul.f32 %v387_v28, %v2173_v37  ;;  %v2328_v60 = vmul.f32 %v387_v28, %v2175_v38  ;;  %v2331_v10 = vmul.f32 %v387_v28, %v2177_v39  ;;  %v2334_v18 = vmul.f32 %v387_v28, %v2179_v40 }
  0xb3   : > { %v2302_v36 = vpop.f32.mrf.mxu0  ;;  %v2321_v54 = vpop.f32.mrf.mxu1 }
  0xb4   : > { %v761_v35 = vpop.permute.xlu1 %760  ;;  %3054 = vst [vmem:[#allocation23_spill] sm:$0xff] %v2302_v36  ;;  %v2316_v52 = vpop.permute.xlu0 %756 }
  0xb5   : > { %v2305_v41 = vmul.f32 %v761_v35, %v2294_v30  ;;  %v2308_v42 = vmul.f32 %v761_v35, %v2296_v31  ;;  %v2311_v25 = vmul.f32 %v761_v35, %v2298_v33  ;;  %v2314_v51 = vmul.f32 %v761_v35, %v2300_v34  ;;  %3059 = vst [vmem:[#allocation28_spill] sm:$0xff] %v2321_v54 }
  0xb6   : > { %1750 = vset.pattern.permute.xlu1 %v3023_v2 }
  0xb7   : > { %3055 = vst [vmem:[#allocation24_spill] sm:$0xff] %v2305_v41  ;;  %1086 = vperm.xlu1 %1750, %v1056_v53  }
  0xb8   : > { %3056 = vst [vmem:[#allocation25_spill] sm:$0xff] %v2308_v42  ;;  %1751 = vset.pattern.permute.xlu2 %v1874_v23 }
  0xb9   : > { %3057 = vst [vmem:[#allocation26_spill] sm:$0xff] %v2311_v25  ;;  %844 = vperm.xlu2 %1751, %v2147_v29   ;;  %v753_v19 = vpop.permute.xlu2 %752 }
  0xba   : > { %3058 = vst [vmem:[#allocation27_spill] sm:$0xff] %v2314_v51  ;;  %v2342_v21 = vmul.f32 %v753_v19, %v2294_v30  ;;  %v2345_v24 = vmul.f32 %v753_v19, %v2296_v31  ;;  %v2348_v26 = vmul.f32 %v753_v19, %v2298_v33  ;;  %v2351_v28 = vmul.f32 %v753_v19, %v2300_v34  ;;  %v2382_v42 = vpop.f32.mrf.mxu2 }
  0xbb   : > { %v2353_v23 = vpop.f32.mrf.mxu0  ;;  %v2367_v16 = vpop.f32.mrf.mxu1  ;;  %3066 = vst [vmem:[#allocation34_spill] sm:$0xff] %v2382_v42 }
  0xbc   : > { %3060 = vst [vmem:[#allocation29_spill] sm:$0xff] %v2345_v24 }
  0xbd   : > { %3061 = vst [vmem:[#allocation30_spill] sm:$0xff] %v2348_v26  ;;  %v641_v35 = vpop.permute.xlu1 %640 }
  0xbe   : > { %3062 = vst [vmem:[#allocation31_spill] sm:$0xff] %v2351_v28  ;;  %v625_v53 = vpop.permute.xlu0 %624  ;;  %v2356_v32 = vmul.f32 %v641_v35, %v2223_v56  ;;  %v2359_v2 = vmul.f32 %v641_v35, %v2225_v57  ;;  %v2362_v27 = vmul.f32 %v641_v35, %v2227_v58  ;;  %v2365_v51 = vmul.f32 %v641_v35, %v2229_v59 }
  0xbf   : > { %v2370_v19 = vmul.f32 %v625_v53, %v2223_v56  ;;  %v2373_v20 = vmul.f32 %v625_v53, %v2225_v57  ;;  %v2376_v25 = vmul.f32 %v625_v53, %v2227_v58  ;;  %v2379_v15 = vmul.f32 %v625_v53, %v2229_v59  ;;  %1752 = vset.pattern.permute.xlu1 %v3065_v1 }
  0xc0   : > { %3063 = vst [vmem:[#allocation32_spill] sm:$0xff] %v2362_v27  ;;  %956 = vperm.xlu1 %1752, %v2147_v29   ;;  %v2398_v29 = vpop.f32.mrf.mxu3 }
  0xc1   : > { %3064 = vst [vmem:[#allocation33_spill] sm:$0xff] %v2365_v51  ;;  %1753 = vset.pattern.permute.xlu2 %v3065_v1 }
  0xc2   : > { %960 = vperm.xlu2 %1753, %v2088_v22   ;;  %v629_v35 = vpop.permute.xlu2 %628  ;;  %3067 = vst [vmem:[#allocation35_spill] sm:$0xff] %v2398_v29  ;;  %v1054_v29 = vld [vmem:[%s3015_s3 + $0x18] sm:$0xff]  ;;  %v2417_v36 = vpop.f32.mrf.mxu2 }
  0xc3   : > { %v659_v0 = vmul.f32 %v629_v35, %v2223_v56  ;;  %v660_v28 = vmul.f32 %v629_v35, %v2225_v57  ;;  %v2390_v14 = vmul.f32 %v629_v35, %v2227_v58  ;;  %v2393_v53 = vmul.f32 %v629_v35, %v2229_v59  ;;  %v501_v41 = vpop.f32.mrf.mxu0  ;;  %v530_v1 = vpop.f32.mrf.mxu1  ;;  %v1053_v35 = vld [vmem:[%s3015_s3 + $0x10] sm:$0xff] }
  0xc6   : > { %v382_v22 = vpop.permute.xlu1 %381 }
  0xc7   : > { %v417_v51 = vmul.f32 %v382_v22, %v2173_v37  ;;  %v418_v13 = vmul.f32 %v382_v22, %v2175_v38  ;;  %v2402_v42 = vpop.permute.xlu0 %980  ;;  %v419_v54 = vmul.f32 %v382_v22, %v2177_v39  ;;  %v2409_v50 = vmul.f32 %v382_v22, %v2179_v40 }
  0xc8   : > { %1754 = vset.pattern.permute.xlu1 %v3068_v63  ;;  %v1622_v22 = vsel %vm827_vm14, 1.0, %v3069_v49  ;;  %v585_v7 = vpop.f32.mrf.mxu3 }
  0xc9   : > { %v502_v26 = vadd.f32 %v501_v41, %v417_v51  ;;  %v531_v27 = vadd.f32 %v530_v1, %v418_v13  ;;  %1071 = vperm.xlu1 %1754, %v1053_v35   ;;  %v1625_v13 = vsel %vm830_vm1, 1.0, %v3069_v49  ;;  %v2445_v24 = vperm.slane %v1622_v22, 0 }
  0xca   : > { %1755 = vset.pattern.permute.xlu2 %v3068_v63  ;;  %v1627_v63 = vsel %vm940_vm3, 1.0, %v3069_v49  ;;  %v2457_v5 = vperm.slane %v1625_v13, 0 }
  0xcb   : > { %1076 = vperm.xlu2 %1755, %v1054_v29   ;;  %v2433_v41 = vpop.permute.xlu2 %860  ;;  %v2435_v51 = vadd.f32 %v659_v0, %v502_v26  ;;  %v2437_v1 = vadd.f32 %v660_v28, %v531_v27  ;;  %v503_v35 = vpop.f32.mrf.mxu0  ;;  %3072 = vst [vmem:[#allocation38_spill] sm:$0xff] %v2445_v24  ;;  %v2452_v0 = vperm.slane %v1624_v62, 0  ;;  %v1628_v27 = vsel %vm941_vm4, 1.0, %v3069_v49  ;;  %v1052_v62 = vld [vmem:[%s3015_s3 + $0x8] sm:$0xff] }
  0xcc   : > { %v2450_v17 = vadd.f32 %v503_v35, %v2325_v55  ;;  %v1629_v26 = vsel %vm942_vm5, 1.0, %v3069_v49  ;;  %v2460_v28 = vperm.slane %v1626_v46, 0  ;;  %v2462_v29 = vperm.slane %v1627_v63, 0  ;;  %v532_v8 = vpop.f32.mrf.mxu1  ;;  %v1185_v63 = vld [vmem:[%s3017_s5 + $0x10] sm:$0xff] }
  0xcd   : > { %3070 = vst [vmem:[#allocation36_spill] sm:$0xff] %v2435_v51  ;;  %v2468_v55 = vadd.f32 %v532_v8, %v2328_v60  ;;  %v2482_v35 = vperm.slane %v1628_v27, 0  ;;  %v2488_v60 = vmul.f32 %v2261_v9, %v2445_v24  ;;  %v559_v8 = vpop.f32.mrf.mxu2  ;;  %v2503_v27 = vmul.f32 %v2261_v9, %v2457_v5 }
  0xce   : > { %3071 = vst [vmem:[#allocation37_spill] sm:$0xff] %v2437_v1  ;;  %v2484_v1 = vperm.slane %v1629_v26, 0  ;;  %v560_v26 = vadd.f32 %v559_v8, %v419_v54  ;;  %v2527_v54 = vmul.f32 %v2402_v42, %v2462_v29 }
  0xcf   : > { %v749_v22 = vpop.permute.xlu1 %748  ;;  %3074 = vst [vmem:[#allocation40_spill] sm:$0xff] %v2468_v55  ;;  %v2477_v46 = vpop.permute.xlu0 %972  ;;  %v2499_v55 = vmul.f32 %v2261_v9, %v2452_v0 }
  0xd0   : > { %v779_v11 = vmul.f32 %v749_v22, %v2294_v30  ;;  %v2472_v13 = vmul.f32 %v749_v22, %v2296_v31  ;;  %v2475_v49 = vmul.f32 %v749_v22, %v2298_v33  ;;  %3076 = vst [vmem:[#allocation42_spill] sm:$0xff] %v2484_v1  ;;  %v2491_v51 = vmul.f32 %v749_v22, %v2300_v34 }
  0xd1   : > { %3077 = vst [vmem:[#allocation43_spill] sm:$0xff] %v2488_v60  ;;  %1066 = vperm.xlu1 %1754, %v1052_v62   ;;  %v2507_v60 = vmul.f32 %v2316_v52, %v2294_v30  ;;  %v2511_v22 = vmul.f32 %v2316_v52, %v2296_v31  ;;  %v2531_v62 = vmul.f32 %v2402_v42, %v2482_v35 }
  0xd2   : > { %3075 = vst [vmem:[#allocation41_spill] sm:$0xff] %v2475_v49  ;;  %v2495_v49 = vmul.f32 %v2261_v9, %v2447_v6  ;;  %v2523_v9 = vmul.f32 %v2402_v42, %v2460_v28  ;;  %v2534_v8 = vadd.f32 %v2390_v14, %v560_v26  ;;  %v892_v14 = vmul.f32 %v2433_v41, %v2447_v6 }
  0xd3   : > { %3078 = vst [vmem:[#allocation44_spill] sm:$0xff] %v2491_v51  ;;  %1199 = vperm.xlu2 %1755, %v1185_v63  }
  0xd4   : > { %3079 = vst [vmem:[#allocation45_spill] sm:$0xff] %v2495_v49  ;;  %v2515_v49 = vmul.f32 %v2316_v52, %v2298_v33 }
  0xd5   : > { %3080 = vst [vmem:[#allocation46_spill] sm:$0xff] %v2499_v55  ;;  %v2519_v55 = vmul.f32 %v2316_v52, %v2300_v34 }
  0xd6   : > { %3081 = vst [vmem:[#allocation47_spill] sm:$0xff] %v2503_v27  ;;  %v506_v27 = vpop.f32.mrf.mxu0 }
  0xd7   : > { %3082 = vst [vmem:[#allocation48_spill] sm:$0xff] %v2507_v60  ;;  %v507_v52 = vadd.f32 %v506_v27, %v2187_v43 }
  0xd8   : > { %3083 = vst [vmem:[#allocation49_spill] sm:$0xff] %v2511_v22  ;;  %v588_v22 = vpop.f32.mrf.mxu3 }
  0xd9   : > { %3084 = vst [vmem:[#allocation50_spill] sm:$0xff] %v2515_v49  ;;  %v377_v49 = vpop.permute.xlu2 %376  ;;  %v589_v43 = vadd.f32 %v588_v22, %v2409_v50  ;;  %v699_v27 = vadd.f32 %v2247_v3, %v507_v52  ;;  %v965_v50 = vpop.permute.xlu0 %964  ;;  %v1183_v3 = vld [vmem:[%s3017_s5] sm:$0xff] }
  0xda   : > { %3085 = vst [vmem:[#allocation51_spill] sm:$0xff] %v2519_v55  ;;  %v413_v63 = vmul.f32 %v377_v49, %v2173_v37  ;;  %v414_v55 = vmul.f32 %v377_v49, %v2175_v38  ;;  %v416_v26 = vmul.f32 %v377_v49, %v2179_v40  ;;  %v2560_v22 = vpop.permute.xlu1 %984  ;;  %v2569_v52 = vmul.f32 %v965_v50, %v2460_v28 }
  0xdb   : > { %3086 = vst [vmem:[#allocation52_spill] sm:$0xff] %v2523_v9  ;;  %v415_v9 = vmul.f32 %v377_v49, %v2177_v39  ;;  %1189 = vperm.xlu2 %1755, %v1183_v3  }
  0xdc   : > { %3087 = vst [vmem:[#allocation53_spill] sm:$0xff] %v2527_v54  ;;  %v2542_v54 = vmul.f32 %v2402_v42, %v2484_v1  ;;  %v499_v51 = vadd.f32 %v2353_v23, %v413_v63  ;;  %v528_v60 = vadd.f32 %v2367_v16, %v414_v55  ;;  %v1186_v42 = vld [vmem:[%s3017_s5 + $0x18] sm:$0xff]  ;;  %v2566_v16 = vadd.f32 %v2393_v53, %v589_v43  ;;  %v561_v23 = vpop.f32.mrf.mxu2 }
  0xdd   : > { %3088 = vst [vmem:[#allocation54_spill] sm:$0xff] %v2531_v62  ;;  %v891_v62 = vmul.f32 %v2433_v41, %v2445_v24  ;;  %v557_v49 = vadd.f32 %v2417_v36, %v415_v9  ;;  %v586_v24 = vadd.f32 %v585_v7, %v416_v26  ;;  %v811_v55 = vadd.f32 %v779_v11, %v699_v27 }
  0xde   : > { %3089 = vst [vmem:[#allocation55_spill] sm:$0xff] %v2534_v8  ;;  %v535_v8 = vpop.f32.mrf.mxu1  ;;  %v562_v36 = vadd.f32 %v561_v23, %v2331_v10  ;;  %v2577_v9 = vmul.f32 %v965_v50, %v2482_v35  ;;  %1204 = vperm.xlu1 %1754, %v1186_v42   ;;  %v2584_v53 = vmul.f32 %v2433_v41, %v2452_v0  ;;  %v508_v43 = vpop.f32.mrf.mxu0 }
  0xdf   : > { %3090 = vst [vmem:[#allocation56_spill] sm:$0xff] %v2542_v54  ;;  %v1003_v54 = vmul.f32 %v2477_v46, %v2460_v28  ;;  %v536_v6 = vadd.f32 %v535_v8, %v2190_v44  ;;  %v2572_v44 = vmul.f32 %v965_v50, %v2462_v29  ;;  %v2580_v8 = vmul.f32 %v965_v50, %v2484_v1 }
  0xe0   : > { %3091 = vst [vmem:[#allocation57_spill] sm:$0xff] %v2560_v22  ;;  %v2588_v11 = vmul.f32 %v2433_v41, %v2457_v5  ;;  %v923_v63 = vadd.f32 %v891_v62, %v811_v55  ;;  %v433_v10 = vmul.f32 %v2231_v61, %v2173_v37  ;;  %v434_v27 = vmul.f32 %v2231_v61, %v2175_v38  ;;  %v590_v23 = vpop.f32.mrf.mxu3 }
  0xe1   : > { %3092 = vst [vmem:[#allocation58_spill] sm:$0xff] %v2569_v52  ;;  %v700_v7 = vadd.f32 %v2250_v4, %v536_v6  ;;  %v1004_v4 = vmul.f32 %v2477_v46, %v2462_v29  ;;  %v2596_v6 = vmul.f32 %v2477_v46, %v2482_v35  ;;  %v2603_v41 = vmul.f32 %v2477_v46, %v2484_v1  ;;  %v745_v42 = vpop.permute.xlu2 %744  ;;  %v3104_v52 = vld [vmem:[#allocation29_spill] sm:$0xff] }
  0xe2   : > { %3093 = vst [vmem:[#allocation59_spill] sm:$0xff] %v2572_v44  ;;  %v509_v62 = vadd.f32 %v508_v43, %v2200_v47  ;;  %v2608_v50 = vmul.f32 %v2231_v61, %v2177_v39  ;;  %v2610_v3 = vadd.f32 %v1003_v54, %v923_v63  ;;  %v2622_v47 = vmul.f32 %v2267_v12, %v2173_v37 }
  0xe3   : > { %3094 = vst [vmem:[#allocation60_spill] sm:$0xff] %v2577_v9  ;;  %v812_v26 = vadd.f32 %v2472_v13, %v700_v7  ;;  %v2614_v13 = vmul.f32 %v2560_v22, %v2460_v28  ;;  %v2618_v7 = vmul.f32 %v2231_v61, %v2179_v40  ;;  %v591_v46 = vadd.f32 %v590_v23, %v2334_v18  ;;  %v3103_v9 = vld [vmem:[#allocation17_spill] sm:$0xff] }
  0xe4   : > { %3095 = vst [vmem:[#allocation61_spill] sm:$0xff] %v2580_v8  ;;  %v2627_v54 = vmul.f32 %v2560_v22, %v2462_v29  ;;  %v2631_v43 = vadd.f32 %v2370_v19, %v499_v51  ;;  %v2637_v8 = vadd.f32 %v2373_v20, %v528_v60  ;;  %v2640_v18 = vadd.f32 %v2376_v25, %v557_v49  ;;  %v633_v49 = vpop.permute.xlu1 %632 }
  0xe5   : > { %3096 = vst [vmem:[#allocation62_spill] sm:$0xff] %v2610_v3  ;;  %v924_v55 = vadd.f32 %v892_v14, %v812_v26  ;;  %v703_v14 = vadd.f32 %v2356_v32, %v509_v62  ;;  %v1325_v26 = vld [vmem:[#allocation2] sm:$0x1]  ;;  %v2634_v3 = vpop.permute.xlu0 %872  ;;  %v2643_v23 = vadd.f32 %v2379_v15, %v586_v24  ;;  %v2647_v32 = vmul.f32 %v2560_v22, %v2482_v35  ;;  %v564_v62 = vpop.f32.mrf.mxu2 }
  0xe6   : > { %v537_v63 = vpop.f32.mrf.mxu1  ;;  %3097 = vst [vmem:[#allocation63_spill] sm:$0xff] %v2631_v43  ;;  %v776_v51 = vmul.f32 %v745_v42, %v2296_v31  ;;  %v565_v20 = vadd.f32 %v564_v62, %v2193_v45  ;;  %v777_v25 = vmul.f32 %v745_v42, %v2298_v33  ;;  %1328 = vperm.xlu1 %1754, %v1325_v26   ;;  %v3110_v43 = vld [vmem:[#allocation10_spill] sm:$0xff] }
  0xe7   : > { %v538_v61 = vadd.f32 %v537_v63, %v2203_v48  ;;  %3098 = vst [vmem:[#allocation64_spill] sm:$0xff] %v2637_v8  ;;  %v815_v19 = vadd.f32 %v2342_v21, %v703_v14  ;;  %v775_v48 = vmul.f32 %v745_v42, %v2294_v30  ;;  %v2655_v15 = vadd.f32 %v1004_v4, %v924_v55  ;;  %v3105_v55 = vld [vmem:[#allocation40_spill] sm:$0xff] }
  0xe8   : > { %3099 = vst [vmem:[#allocation65_spill] sm:$0xff] %v2640_v18  ;;  %v663_v24 = vmul.f32 %v633_v49, %v2223_v56  ;;  %v664_v63 = vmul.f32 %v633_v49, %v2225_v57  ;;  %v665_v21 = vmul.f32 %v633_v49, %v2227_v58  ;;  %v666_v14 = vmul.f32 %v633_v49, %v2229_v59  ;;  %v593_v8 = vpop.f32.mrf.mxu3  ;;  %v3107_v49 = vld [vmem:[#allocation38_spill] sm:$0xff] }
  0xe9   : > { %3100 = vst [vmem:[#allocation66_spill] sm:$0xff] %v2643_v23  ;;  %v704_v60 = vadd.f32 %v2359_v2, %v538_v61  ;;  %v701_v44 = vadd.f32 %v3103_v9, %v565_v20  ;;  %v778_v2 = vmul.f32 %v745_v42, %v2300_v34  ;;  %v511_v61 = vpop.f32.mrf.mxu0  ;;  %v438_v26 = vmul.f32 %v2267_v12, %v2175_v38  ;;  %v3106_v23 = vld [vmem:[#allocation41_spill] sm:$0xff] }
  0xea   : > { %3101 = vst [vmem:[#allocation67_spill] sm:$0xff] %v2647_v32  ;;  %v695_v4 = vadd.f32 %v663_v24, %v2450_v17  ;;  %v696_v62 = vadd.f32 %v664_v63, %v3105_v55  ;;  %v698_v22 = vadd.f32 %v666_v14, %v591_v46  ;;  %v2671_v9 = vmul.f32 %v2634_v3, %v3107_v49 }
  0xeb   : > { %3102 = vst [vmem:[#allocation68_spill] sm:$0xff] %v2655_v15  ;;  %v816_v45 = vadd.f32 %v3104_v52, %v704_v60  ;;  %v697_v15 = vadd.f32 %v665_v21, %v562_v36  ;;  %v813_v18 = vadd.f32 %v3106_v23, %v701_v44  ;;  %v3108_v52 = vld [vmem:[#allocation39_spill] sm:$0xff]  ;;  %v512_v20 = vadd.f32 %v511_v61, %v433_v10  ;;  %v2677_v60 = vpop.permute.xlu2 %1091  ;;  %v3111_v23 = vld [vmem:[#allocation13_spill] sm:$0xff]  ;;  %v3112_v10 = vld [vmem:[#allocation18_spill] sm:$0xff] }
  0xec   : > { %v2675_v42 = vmul.f32 %v2634_v3, %v3108_v52  ;;  %3109 = vst [vmem:[#allocation17_spill] sm:$0xff] %v2677_v60  ;;  %v594_v17 = vadd.f32 %v593_v8, %v3110_v43  ;;  %v2680_v63 = vadd.f32 %v775_v48, %v695_v4  ;;  %v2682_v36 = vadd.f32 %v776_v51, %v696_v62  ;;  %v3113_v51 = vld [vmem:[#allocation11_spill] sm:$0xff]  ;;  %v3116_v62 = vld [vmem:[#allocation44_spill] sm:$0xff] }
  0xed   : > { %v2684_v44 = vadd.f32 %v777_v25, %v697_v15  ;;  %v925_v46 = vadd.f32 %v2584_v53, %v813_v18  ;;  %v707_v21 = vadd.f32 %v3111_v23, %v512_v20  ;;  %v865_v55 = vpop.permute.xlu0 %864  ;;  %v2688_v32 = vadd.f32 %v778_v2, %v698_v22  ;;  %v566_v1 = vpop.f32.mrf.mxu2  ;;  %v3114_v15 = vld [vmem:[#allocation48_spill] sm:$0xff]  ;;  %v3115_v53 = vld [vmem:[#allocation14_spill] sm:$0xff]  ;;  %v3120_v60 = vld [vmem:[#allocation43_spill] sm:$0xff] }
  0xee   : > { %v540_v24 = vpop.f32.mrf.mxu1  ;;  %v702_v61 = vadd.f32 %v3112_v10, %v594_v17  ;;  %v895_v8 = vmul.f32 %v865_v55, %v3107_v49  ;;  %v896_v43 = vmul.f32 %v865_v55, %v3108_v52  ;;  %v897_v48 = vmul.f32 %v865_v55, %v2452_v0  ;;  %v372_v17 = vpop.permute.xlu1 %371  ;;  %v3119_v23 = vld [vmem:[#allocation32_spill] sm:$0xff] }
  0xef   : > { %v541_v14 = vadd.f32 %v540_v24, %v434_v27  ;;  %v567_v25 = vadd.f32 %v566_v1, %v3113_v51  ;;  %v819_v4 = vadd.f32 %v3114_v15, %v707_v21  ;;  %v898_v27 = vmul.f32 %v865_v55, %v2457_v5  ;;  %v3121_v21 = vld [vmem:[#allocation49_spill] sm:$0xff]  ;;  %v3124_v15 = vld [vmem:[#allocation23_spill] sm:$0xff] }
  0xf0   : > { %v814_v22 = vadd.f32 %v3116_v62, %v702_v61  ;;  %v2699_v2 = vadd.f32 %v895_v8, %v815_v19  ;;  %v2701_v20 = vadd.f32 %v896_v43, %v816_v45  ;;  %v2704_v24 = vadd.f32 %v2596_v6, %v925_v46  ;;  %v3122_v46 = vld [vmem:[#allocation30_spill] sm:$0xff]  ;;  %v595_v43 = vpop.f32.mrf.mxu3 }
  0xf1   : > { %v708_v18 = vadd.f32 %v3115_v53, %v541_v14  ;;  %v705_v10 = vadd.f32 %v3119_v23, %v567_v25  ;;  %v2708_v1 = vadd.f32 %v3120_v60, %v819_v4  ;;  %v409_v14 = vmul.f32 %v372_v17, %v2173_v37  ;;  %v513_v55 = vpop.f32.mrf.mxu0  ;;  %v3123_v25 = vld [vmem:[#allocation45_spill] sm:$0xff]  ;;  %v3125_v53 = vld [vmem:[#allocation12_spill] sm:$0xff]  ;;  %v3128_v23 = vld [vmem:[#allocation35_spill] sm:$0xff] }
  0xf2   : > { %3117 = vst [vmem:[#allocation29_spill] sm:$0xff] %v2701_v20  ;;  %v2713_v61 = vadd.f32 %v2588_v11, %v814_v22  ;;  %v410_v19 = vmul.f32 %v372_v17, %v2175_v38  ;;  %v411_v45 = vmul.f32 %v372_v17, %v2177_v39  ;;  %v412_v6 = vmul.f32 %v372_v17, %v2179_v40  ;;  %v3126_v11 = vld [vmem:[#allocation28_spill] sm:$0xff]  ;;  %v3127_v22 = vld [vmem:[#allocation34_spill] sm:$0xff] }
  0xf3   : > { %3118 = vst [vmem:[#allocation40_spill] sm:$0xff] %v2704_v24  ;;  %v820_v51 = vadd.f32 %v3121_v21, %v708_v18  ;;  %v817_v8 = vadd.f32 %v3122_v46, %v705_v10  ;;  %v497_v4 = vadd.f32 %v3124_v15, %v409_v14  ;;  %v514_v37 = vadd.f32 %v513_v55, %v2622_v47  ;;  %v621_v17 = vpop.permute.xlu2 %620  ;;  %v3129_v10 = vld [vmem:[#allocation19_spill] sm:$0xff]  ;;  %v3130_v14 = vld [vmem:[#allocation33_spill] sm:$0xff] }
  0xf4   : > { %v596_v18 = vadd.f32 %v595_v43, %v3125_v53  ;;  %v526_v62 = vadd.f32 %v3126_v11, %v410_v19  ;;  %v555_v38 = vadd.f32 %v3127_v22, %v411_v45  ;;  %v584_v21 = vadd.f32 %v3128_v23, %v412_v6  ;;  %v3131_v43 = vld [vmem:[#allocation24_spill] sm:$0xff]  ;;  %v3135_v22 = vld [vmem:[#allocation25_spill] sm:$0xff] }
  0xf5   : > { %v2720_v60 = vadd.f32 %v3123_v25, %v820_v51  ;;  %v2728_v20 = vadd.f32 %v897_v48, %v817_v8  ;;  %v711_v46 = vadd.f32 %v3129_v10, %v514_v37  ;;  %v651_v25 = vmul.f32 %v621_v17, %v2223_v56  ;;  %v569_v47 = vpop.f32.mrf.mxu2  ;;  %v3132_v48 = vld [vmem:[#allocation20_spill] sm:$0xff] }
  0xf6   : > { %v542_v24 = vpop.f32.mrf.mxu1  ;;  %v706_v15 = vadd.f32 %v3130_v14, %v596_v18  ;;  %v652_v55 = vmul.f32 %v621_v17, %v2225_v57  ;;  %v653_v19 = vmul.f32 %v621_v17, %v2227_v58  ;;  %v654_v45 = vmul.f32 %v621_v17, %v2229_v59  ;;  %v3134_v57 = vld [vmem:[#allocation15_spill] sm:$0xff]  ;;  %v741_v17 = vpop.permute.xlu1 %740 }
  0xf7   : > { %v543_v51 = vadd.f32 %v542_v24, %v438_v26  ;;  %v570_v6 = vadd.f32 %v569_v47, %v2608_v50  ;;  %v823_v53 = vadd.f32 %v3131_v43, %v711_v46  ;;  %v2739_v11 = vadd.f32 %v651_v25, %v497_v4  ;;  %v3133_v26 = vld [vmem:[#allocation31_spill] sm:$0xff]  ;;  %v3138_v47 = vld [vmem:[#allocation37_spill] sm:$0xff] }
  0xf8   : > { %v818_v24 = vadd.f32 %v3133_v26, %v706_v15  ;;  %v2742_v56 = vadd.f32 %v652_v55, %v526_v62  ;;  %v2744_v37 = vadd.f32 %v653_v19, %v555_v38  ;;  %v2746_v18 = vadd.f32 %v654_v45, %v584_v21  ;;  %v3136_v21 = vld [vmem:[#allocation50_spill] sm:$0xff]  ;;  %v3139_v19 = vld [vmem:[#allocation55_spill] sm:$0xff] }
  0xf9   : > { %v712_v8 = vadd.f32 %v3132_v48, %v543_v51  ;;  %v709_v58 = vadd.f32 %v3134_v57, %v570_v6  ;;  %v935_v59 = vadd.f32 %v2671_v9, %v823_v53  ;;  %v439_v23 = vmul.f32 %v2267_v12, %v2177_v39  ;;  %v598_v51 = vpop.f32.mrf.mxu3  ;;  %v3141_v53 = vld [vmem:[#allocation16_spill] sm:$0xff] }
  0xfa   : > { %v2753_v4 = vadd.f32 %v898_v27, %v818_v24  ;;  %v771_v10 = vmul.f32 %v741_v17, %v2294_v30  ;;  %v772_v62 = vmul.f32 %v741_v17, %v2296_v31  ;;  %v773_v38 = vmul.f32 %v741_v17, %v2298_v33  ;;  %v3137_v27 = vld [vmem:[#allocation36_spill] sm:$0xff] }
  0xfb   : > { %v824_v50 = vadd.f32 %v3135_v22, %v712_v8  ;;  %v821_v46 = vadd.f32 %v3136_v21, %v709_v58  ;;  %v440_v9 = vmul.f32 %v2267_v12, %v2179_v40  ;;  %v774_v14 = vmul.f32 %v741_v17, %v2300_v34  ;;  %v3140_v40 = vld [vmem:[#allocation46_spill] sm:$0xff]  ;;  %v849_v58 = vpop.permute.xlu0 %848 }
  0xfc   : > { %v599_v39 = vadd.f32 %v598_v51, %v2618_v7  ;;  %v2765_v15 = vadd.f32 %v771_v10, %v3137_v27  ;;  %v2768_v55 = vadd.f32 %v772_v62, %v3138_v47  ;;  %v2771_v45 = vadd.f32 %v773_v38, %v3139_v19  ;;  %v857_v7 = vpop.permute.xlu2 %856  ;;  %v3143_v10 = vld [vmem:[#allocation51_spill] sm:$0xff]  ;;  %v3144_v51 = vld [vmem:[#allocation21_spill] sm:$0xff] }
  0xfd   : > { %v936_v25 = vadd.f32 %v2675_v42, %v824_v50  ;;  %v905_v6 = vmul.f32 %v2634_v3, %v2452_v0  ;;  %v906_v42 = vmul.f32 %v2634_v3, %v2457_v5  ;;  %v933_v12 = vadd.f32 %v3140_v40, %v821_v46  ;;  %v571_v8 = vpop.f32.mrf.mxu2  ;;  %v3142_v3 = vld [vmem:[#allocation52_spill] sm:$0xff]  ;;  %v3148_v40 = vld [vmem:[#allocation26_spill] sm:$0xff] }
  0xfe   : > { %v2779_v43 = vadd.f32 %v774_v14, %v2566_v16  ;;  %v710_v48 = vadd.f32 %v3141_v53, %v599_v39  ;;  %v887_v26 = vmul.f32 %v857_v7, %v3107_v49  ;;  %v888_v24 = vmul.f32 %v857_v7, %v3108_v52  ;;  %v3146_v39 = vld [vmem:[#allocation47_spill] sm:$0xff] }
  0xff   : > { %v889_v57 = vmul.f32 %v857_v7, %v2452_v0  ;;  %v572_v22 = vadd.f32 %v571_v8, %v439_v23  ;;  %v890_v50 = vmul.f32 %v857_v7, %v2457_v5  ;;  %v1043_v17 = vadd.f32 %v3142_v3, %v2708_v1 }
 0x100   : > { %v1047_v16 = vadd.f32 %v2614_v13, %v935_v59  ;;  %v822_v62 = vadd.f32 %v3143_v10, %v710_v48  ;;  %v2791_v38 = vadd.f32 %v887_v26, %v2680_v63  ;;  %v2794_v21 = vadd.f32 %v888_v24, %v2682_v36  ;;  %v3145_v13 = vld [vmem:[#allocation53_spill] sm:$0xff]  ;;  %v977_v63 = vpop.permute.xlu1 %976  ;;  %v3147_v36 = vld [vmem:[#allocation54_spill] sm:$0xff] }
 0x101   : > { %v2797_v46 = vadd.f32 %v889_v57, %v2684_v44  ;;  %v713_v23 = vadd.f32 %v3144_v51, %v572_v22  ;;  %v2801_v14 = vadd.f32 %v890_v50, %v2688_v32  ;;  %v879_v1 = vmul.f32 %v849_v58, %v3107_v49  ;;  %v600_v32 = vpop.f32.mrf.mxu3  ;;  %v3149_v24 = vld [vmem:[#allocation17_spill] sm:$0xff]  ;;  %v3151_v50 = vld [vmem:[#allocation22_spill] sm:$0xff] }
 0x102   : > { %v1044_v59 = vadd.f32 %v3145_v13, %v2720_v60  ;;  %v934_v27 = vadd.f32 %v3146_v39, %v822_v62  ;;  %v1048_v47 = vadd.f32 %v2627_v54, %v936_v25  ;;  %v1045_v19 = vadd.f32 %v3147_v36, %v933_v12  ;;  %v3152_v10 = vld [vmem:[#allocation42_spill] sm:$0xff]  ;;  %v3155_v39 = vld [vmem:[#allocation27_spill] sm:$0xff] }
 0x103   : > { %v2811_v44 = vadd.f32 %v2603_v41, %v2713_v61  ;;  %v825_v7 = vadd.f32 %v3148_v40, %v713_v23  ;;  %v1007_v53 = vmul.f32 %v977_v63, %v2460_v28  ;;  %v1008_v48 = vmul.f32 %v977_v63, %v2462_v29  ;;  %v3150_v61 = vld [vmem:[#allocation56_spill] sm:$0xff] }
 0x104   : > { %v1009_v60 = vmul.f32 %v977_v63, %v2482_v35  ;;  %v601_v8 = vadd.f32 %v600_v32, %v440_v9  ;;  %v880_v26 = vmul.f32 %v849_v58, %v3108_v52  ;;  %v881_v54 = vmul.f32 %v849_v58, %v2452_v0  ;;  %v737_v51 = vpop.permute.xlu2 %736  ;;  %v3153_v9 = vld [vmem:[#allocation29_spill] sm:$0xff]  ;;  %v3157_v32 = vld [vmem:[#allocation63_spill] sm:$0xff] }
 0x105   : > { %v882_v25 = vmul.f32 %v849_v58, %v2457_v5  ;;  %v937_v12 = vadd.f32 %v905_v6, %v825_v7  ;;  %v1123_v41 = vadd.f32 %v3149_v24, %v1043_v17  ;;  %v1046_v57 = vadd.f32 %v3150_v61, %v934_v27  ;;  %v3160_v61 = vld [vmem:[#allocation66_spill] sm:$0xff] }
 0x106   : > { %v2823_v22 = vadd.f32 %v1007_v53, %v2699_v2  ;;  %v714_v3 = vadd.f32 %v3151_v50, %v601_v8  ;;  %v1010_v62 = vmul.f32 %v977_v63, %v3152_v10  ;;  %v2828_v23 = vadd.f32 %v1008_v48, %v3153_v9  ;;  %v3156_v63 = vld [vmem:[#allocation67_spill] sm:$0xff]  ;;  %v3161_v9 = vld [vmem:[#allocation57_spill] sm:$0xff] }
 0x107   : > { %v2831_v13 = vadd.f32 %v1009_v60, %v2728_v20  ;;  %v767_v6 = vmul.f32 %v737_v51, %v2294_v30  ;;  %v768_v58 = vmul.f32 %v737_v51, %v2296_v31  ;;  %v769_v17 = vmul.f32 %v737_v51, %v2298_v33  ;;  %v3158_v20 = vld [vmem:[#allocation64_spill] sm:$0xff]  ;;  %v3159_v60 = vld [vmem:[#allocation65_spill] sm:$0xff] }
 0x108   : > { %v770_v2 = vmul.f32 %v737_v51, %v2300_v34  ;;  %v826_v27 = vadd.f32 %v3155_v39, %v714_v3  ;;  %v1124_v36 = vadd.f32 %v3149_v24, %v1044_v59  ;;  %v1049_v40 = vadd.f32 %v3156_v63, %v937_v12 }
 0x109   : > { %3154 = vst [vmem:[#allocation41_spill] sm:$0xff] %v2831_v13  ;;  %v1125_v7 = vadd.f32 %v3149_v24, %v1045_v19  ;;  %v799_v53 = vadd.f32 %v767_v6, %v3157_v32  ;;  %v800_v48 = vadd.f32 %v768_v58, %v3158_v20  ;;  %v801_v8 = vadd.f32 %v769_v17, %v3159_v60  ;;  %v1097_v17 = vpop.permute.xlu1 %1096 }
 0x10a   : > { %v802_v50 = vadd.f32 %v770_v2, %v3160_v61  ;;  %v1018_v13 = vmul.f32 %v3161_v9, %v3152_v10  ;;  %v938_v51 = vadd.f32 %v906_v42, %v826_v27  ;;  %v1126_v3 = vadd.f32 %v3149_v24, %v1046_v57  ;;  %v3162_v9 = vld [vmem:[#allocation58_spill] sm:$0xff] }
 0x10b   : > { %v2849_v59 = vadd.f32 %v1010_v62, %v2753_v4  ;;  %v2851_v12 = vadd.f32 %v879_v1, %v799_v53  ;;  %v2853_v19 = vadd.f32 %v880_v26, %v800_v48  ;;  %v2855_v6 = vadd.f32 %v881_v54, %v801_v8 }
 0x10c   : > { %v2857_v58 = vadd.f32 %v882_v25, %v802_v50  ;;  %v1127_v39 = vadd.f32 %v1097_v17, %v1047_v16  ;;  %v1128_v2 = vadd.f32 %v1097_v17, %v1048_v47  ;;  %v1129_v63 = vadd.f32 %v1097_v17, %v1049_v40  ;;  %v1082_v53 = vpop.permute.xlu2 %1081 }
 0x10d   : > { %v1050_v32 = vadd.f32 %v1018_v13, %v938_v51  ;;  %v1155_v20 = vmax.f32 %v1123_v41, 0.0  ;;  %v1156_v42 = vmax.f32 %v1124_v36, 0.0  ;;  %v1157_v27 = vmax.f32 %v1125_v7, 0.0 }
 0x10e   : > { %v1159_v24 = vmax.f32 %v1127_v39, 0.0  ;;  %v1160_v57 = vmax.f32 %v1128_v2, 0.0  ;;  %v1161_v4 = vmax.f32 %v1129_v63, 0.0  ;;  %v1158_v1 = vmax.f32 %v1126_v3, 0.0  ;;  %v3163_v3 = vld [vmem:[#allocation59_spill] sm:$0xff]  ;;  %v3164_v39 = vld [vmem:[#allocation60_spill] sm:$0xff] }
 0x10f   : > { %v1130_v62 = vadd.f32 %v1097_v17, %v1050_v32  ;;  %v3165_v63 = vld [vmem:[#allocation61_spill] sm:$0xff] }
 0x110   : > { %v1179_v26 = vpack.c.bf16 %v1159_v24, %v1155_v20  ;;  %v1180_v48 = vpack.c.bf16 %v1160_v57, %v1156_v42  ;;  %v1181_v54 = vpack.c.bf16 %v1161_v4, %v1157_v27 }
 0x111   : > { %v1162_v60 = vmax.f32 %v1130_v62, 0.0  ;;  %v853_v16 = vpop.permute.xlu1 %852 }
 0x112   : > { %1228 = vmatpush.bf16.msrb.mxu0 %v1179_v26  ;;  %1247 = vmatpush.bf16.msrb.mxu1 %v1180_v48  ;;  %v883_v47 = vmul.f32 %v853_v16, %v3107_v49  ;;  %v884_v41 = vmul.f32 %v853_v16, %v3108_v52  ;;  %v885_v13 = vmul.f32 %v853_v16, %v2452_v0 }
 0x113   : > { %v1182_v25 = vpack.c.bf16 %v1162_v60, %v1158_v1  ;;  %1266 = vmatpush.bf16.msrb.mxu2 %v1181_v54  ;;  %v886_v36 = vmul.f32 %v853_v16, %v2457_v5 }
 0x114   : > { %v915_v40 = vadd.f32 %v883_v47, %v2765_v15  ;;  %v916_v7 = vadd.f32 %v884_v41, %v2768_v55  ;;  %v917_v8 = vadd.f32 %v885_v13, %v2771_v45  ;;  %v845_v50 = vpop.permute.xlu2 %844  ;;  %v3166_v13 = vld [vmem:[#allocation62_spill] sm:$0xff] }
 0x115   : > { %1285 = vmatpush.bf16.msrb.mxu3 %v1182_v25  ;;  %v918_v61 = vadd.f32 %v886_v36, %v2779_v43  ;;  %v875_v42 = vmul.f32 %v845_v50, %v3107_v49  ;;  %v876_v27 = vmul.f32 %v845_v50, %v3108_v52  ;;  %v877_v24 = vmul.f32 %v845_v50, %v2452_v0  ;;  %v3167_v36 = vld [vmem:[#allocation68_spill] sm:$0xff] }
 0x116   : > { %v2868_v51 = vadd.f32 %v3162_v9, %v915_v40  ;;  %v2871_v17 = vadd.f32 %v3163_v3, %v916_v7  ;;  %v2874_v2 = vadd.f32 %v3164_v39, %v917_v8  ;;  %v878_v57 = vmul.f32 %v845_v50, %v2457_v5  ;;  %v3168_v7 = vld [vmem:[#allocation40_spill] sm:$0xff] }
 0x117   : > { %v2877_v32 = vadd.f32 %v3165_v63, %v918_v61  ;;  %v1116_v40 = vadd.f32 %v1082_v53, %v3167_v36  ;;  %v1117_v8 = vadd.f32 %v1082_v53, %v3168_v7  ;;  %v1118_v61 = vadd.f32 %v1082_v53, %v2811_v44 }
 0x119   : > { %v733_v15 = vpop.permute.xlu1 %732  ;;  %v1148_v63 = vmax.f32 %v1116_v40, 0.0 }
 0x11a   : > { %v763_v55 = vmul.f32 %v733_v15, %v2294_v30  ;;  %v764_v45 = vmul.f32 %v733_v15, %v2296_v31  ;;  %v765_v43 = vmul.f32 %v733_v15, %v2298_v33  ;;  %v766_v20 = vmul.f32 %v733_v15, %v2300_v34 }
 0x11b   : > { %v1150_v15 = vmax.f32 %v1118_v61, 0.0 }
 0x11c   : > { %v795_v4 = vadd.f32 %v763_v55, %v2739_v11  ;;  %v796_v62 = vadd.f32 %v764_v45, %v2742_v56  ;;  %v797_v30 = vadd.f32 %v765_v43, %v2744_v37  ;;  %v798_v31 = vadd.f32 %v766_v20, %v2746_v18  ;;  %v961_v1 = vpop.permute.xlu2 %960 }
 0x11d   : > { %v991_v33 = vmul.f32 %v961_v1, %v2460_v28  ;;  %v992_v34 = vmul.f32 %v961_v1, %v2462_v29  ;;  %v993_v49 = vmul.f32 %v961_v1, %v2482_v35  ;;  %v994_v52 = vmul.f32 %v961_v1, %v3152_v10 }
 0x11e   : > { %v907_v0 = vadd.f32 %v875_v42, %v795_v4  ;;  %v908_v26 = vadd.f32 %v876_v27, %v796_v62  ;;  %v909_v5 = vadd.f32 %v877_v24, %v797_v30  ;;  %v910_v48 = vadd.f32 %v878_v57, %v798_v31 }
 0x11f   : > { %v2896_v11 = vadd.f32 %v991_v33, %v2851_v12  ;;  %v2899_v56 = vadd.f32 %v992_v34, %v2853_v19  ;;  %v2902_v37 = vadd.f32 %v993_v49, %v2855_v6  ;;  %v2905_v18 = vadd.f32 %v994_v52, %v2857_v58 }
 0x120   : > { %v1115_v58 = vadd.f32 %v1082_v53, %v3166_v13 }
 0x121   : > { %v969_v54 = vpop.permute.xlu1 %968 }
 0x122   : > { %v999_v60 = vmul.f32 %v969_v54, %v2460_v28  ;;  %v1000_v25 = vmul.f32 %v969_v54, %v2462_v29  ;;  %v1001_v16 = vmul.f32 %v969_v54, %v2482_v35  ;;  %v1002_v47 = vmul.f32 %v969_v54, %v3152_v10 }
 0x124   : > { %v1031_v12 = vadd.f32 %v999_v60, %v2791_v38  ;;  %v1032_v19 = vadd.f32 %v1000_v25, %v2794_v21  ;;  %v1033_v41 = vadd.f32 %v1001_v16, %v2797_v46  ;;  %v1034_v6 = vadd.f32 %v1002_v47, %v2801_v14  ;;  %v3169_v38 = vld [vmem:[#allocation41_spill] sm:$0xff] }
 0x125   : > { %v1147_v46 = vmax.f32 %v1115_v58, 0.0  ;;  %v1149_v14 = vmax.f32 %v1117_v8, 0.0  ;;  %v1077_v1 = vpop.permute.xlu2 %1076 }
 0x126   : > { %v1111_v33 = vadd.f32 %v1077_v1, %v1031_v12  ;;  %v1112_v34 = vadd.f32 %v1077_v1, %v1032_v19  ;;  %v1113_v49 = vadd.f32 %v1077_v1, %v1033_v41  ;;  %v1114_v52 = vadd.f32 %v1077_v1, %v1034_v6 }
 0x128   : > { %v1143_v25 = vmax.f32 %v1111_v33, 0.0 }
 0x129   : > { %v1087_v50 = vpop.permute.xlu1 %1086 }
 0x12a   : > { %v1119_v9 = vadd.f32 %v1087_v50, %v2823_v22  ;;  %v1120_v3 = vadd.f32 %v1087_v50, %v2828_v23  ;;  %v1121_v39 = vadd.f32 %v1087_v50, %v3169_v38  ;;  %v1122_v21 = vadd.f32 %v1087_v50, %v2849_v59 }
 0x12c   : > { %v1151_v55 = vmax.f32 %v1119_v9, 0.0  ;;  %v1152_v45 = vmax.f32 %v1120_v3, 0.0  ;;  %v1153_v43 = vmax.f32 %v1121_v39, 0.0  ;;  %v1154_v20 = vmax.f32 %v1122_v21, 0.0 }
 0x12e   : > { %v1175_v42 = vpack.c.bf16 %v1151_v55, %v1147_v46  ;;  %v1176_v27 = vpack.c.bf16 %v1152_v45, %v1148_v63  ;;  %v1177_v44 = vpack.c.bf16 %v1153_v43, %v1149_v14  ;;  %v1178_v53 = vpack.c.bf16 %v1154_v20, %v1150_v15 }
 0x130   : > { %1229 = vmatpush.bf16.msrb.mxu0 %v1175_v42  ;;  %1248 = vmatpush.bf16.msrb.mxu1 %v1176_v27  ;;  %v1200_v27 = vpop.permute.xlu2 %1199 }
 0x131   : > { %1267 = vmatpush.bf16.msrb.mxu2 %v1177_v44  ;;  %1286 = vmatpush.bf16.msrb.mxu3 %v1178_v53 }
 0x132   : > { %v957_v22 = vpop.permute.xlu1 %956 }
 0x133   : > { %v987_v23 = vmul.f32 %v957_v22, %v2460_v28  ;;  %v988_v59 = vmul.f32 %v957_v22, %v2462_v29  ;;  %v989_v24 = vmul.f32 %v957_v22, %v2482_v35  ;;  %v990_v57 = vmul.f32 %v957_v22, %v3152_v10 }
 0x134   : > { %v1144_v10 = vmax.f32 %v1112_v34, 0.0 }
 0x135   : > { %v1019_v4 = vadd.f32 %v987_v23, %v907_v0  ;;  %v1020_v62 = vadd.f32 %v988_v59, %v908_v26  ;;  %v1021_v30 = vadd.f32 %v989_v24, %v909_v5  ;;  %v1022_v31 = vadd.f32 %v990_v57, %v910_v48  ;;  %v1062_v5 = vpop.permute.xlu0 %1061 }
 0x136   : > { %v1145_v0 = vmax.f32 %v1113_v49, 0.0  ;;  %v1146_v26 = vmax.f32 %v1114_v52, 0.0 }
 0x137   : > { %v1100_v58 = vadd.f32 %v1062_v5, %v1020_v62  ;;  %v1102_v36 = vadd.f32 %v1062_v5, %v1022_v31 }
 0x138   : > { %v1190_v33 = vpop.permute.xlu2 %1189 }
 0x139   : > { %v1132_v50 = vmax.f32 %v1100_v58, 0.0  ;;  %v1134_v3 = vmax.f32 %v1102_v36, 0.0 }
 0x13b   : > { %v1072_v54 = vpop.permute.xlu1 %1071 }
 0x13c   : > { %v1107_v60 = vadd.f32 %v1072_v54, %v2868_v51  ;;  %v1108_v28 = vadd.f32 %v1072_v54, %v2871_v17  ;;  %v1109_v29 = vadd.f32 %v1072_v54, %v2874_v2  ;;  %v1110_v35 = vadd.f32 %v1072_v54, %v2877_v32 }
 0x13d   : > { %v1099_v51 = vadd.f32 %v1062_v5, %v1019_v4  ;;  %v1101_v17 = vadd.f32 %v1062_v5, %v1021_v30  ;;  %v1195_v59 = vpop.permute.xlu0 %1194 }
 0x13e   : > { %v1139_v48 = vmax.f32 %v1107_v60, 0.0  ;;  %v1140_v16 = vmax.f32 %v1108_v28, 0.0  ;;  %v1141_v47 = vmax.f32 %v1109_v29, 0.0  ;;  %v1142_v12 = vmax.f32 %v1110_v35, 0.0 }
 0x13f   : > { %v1131_v61 = vmax.f32 %v1099_v51, 0.0  ;;  %v1133_v9 = vmax.f32 %v1101_v17, 0.0 }
 0x140   : > { %v1171_v19 = vpack.c.bf16 %v1143_v25, %v1139_v48  ;;  %v1172_v41 = vpack.c.bf16 %v1144_v10, %v1140_v16  ;;  %v1173_v6 = vpack.c.bf16 %v1145_v0, %v1141_v47  ;;  %v1174_v13 = vpack.c.bf16 %v1146_v26, %v1142_v12 }
 0x142   : > { %1230 = vmatpush.bf16.msrb.mxu0 %v1171_v19  ;;  %1249 = vmatpush.bf16.msrb.mxu1 %v1172_v41 }
 0x143   : > { %1268 = vmatpush.bf16.msrb.mxu2 %v1173_v6  ;;  %1287 = vmatpush.bf16.msrb.mxu3 %v1174_v13  ;;  %v1067_v2 = vpop.permute.xlu1 %1066 }
 0x144   : > { %v1103_v32 = vadd.f32 %v1067_v2, %v2896_v11  ;;  %v1104_v40 = vadd.f32 %v1067_v2, %v2899_v56  ;;  %v1105_v7 = vadd.f32 %v1067_v2, %v2902_v37  ;;  %v1106_v8 = vadd.f32 %v1067_v2, %v2905_v18  ;;  %v1663_v11 = vld [vmem:[%s3016_s4] sm:$0xff]  ;;  %v1664_v56 = vld [vmem:[%s3016_s4 + $0x8] sm:$0xff] }
 0x146   : > { %v1135_v38 = vmax.f32 %v1103_v32, 0.0  ;;  %v1136_v39 = vmax.f32 %v1104_v40, 0.0  ;;  %v1137_v21 = vmax.f32 %v1105_v7, 0.0  ;;  %v1138_v46 = vmax.f32 %v1106_v8, 0.0 }
 0x148   : > { %v1167_v63 = vpack.c.bf16 %v1135_v38, %v1131_v61  ;;  %v1168_v14 = vpack.c.bf16 %v1136_v39, %v1132_v50  ;;  %v1169_v15 = vpack.c.bf16 %v1137_v21, %v1133_v9  ;;  %v1170_v55 = vpack.c.bf16 %v1138_v46, %v1134_v3  ;;  %v1316_v21 = vld [vmem:[%s3018_s6] sm:$0x1] }
 0x14a   : > { %1231 = vmatpush.bf16.msrb.mxu0 %v1167_v63  ;;  %1250 = vmatpush.bf16.msrb.mxu1 %v1168_v14 }
 0x14b   : > { %1269 = vmatpush.bf16.msrb.mxu2 %v1169_v15  ;;  %1288 = vmatpush.bf16.msrb.mxu3 %v1170_v55 }
 0x14d   : > { %1638 = vmatmul.msk.bf16.vlgmr.msrb.gmra.mxu0 %vm1217_vm6, %v1663_v11  ;;  %1640 = vmatmul.msk.bf16.vlgmr.msrb.gmra.mxu1 %vm1217_vm6, %v1663_v11 }
 0x14e   : > { %1642 = vmatmul.msk.bf16.vlgmr.msrb.gmra.mxu2 %vm1217_vm6, %v1663_v11  ;;  %1644 = vmatmul.msk.bf16.vlgmr.msrb.gmra.mxu3 %vm1217_vm6, %v1663_v11 }
 0x150   : > { %v1205_v24 = vpop.permute.xlu1 %1204 }
 0x158   : > { %v1329_v55 = vpop.permute.xlu1 %1328 }
 0x159   : > { %v1331_v11 = vperm.slane %v1329_v55, 0 }
 0x15d   : > { %1639 = vmatmul.msk.bf16.gmra.mxu0 %vm1217_vm6, %v1664_v56  ;;  %1641 = vmatmul.msk.bf16.gmra.mxu1 %vm1217_vm6, %v1664_v56 }
 0x15e   : > { %1643 = vmatmul.msk.bf16.gmra.mxu2 %vm1217_vm6, %v1664_v56  ;;  %1645 = vmatmul.msk.bf16.gmra.mxu3 %vm1217_vm6, %v1664_v56 }
 0x1ca   : > { %v1233_v37 = vpop.f32.mrf.mxu0  ;;  %v1252_v18 = vpop.f32.mrf.mxu1 }
 0x1cb   : > { %v1234_v60 = vadd.f32 %v1233_v37, %v1190_v33  ;;  %v1253_v28 = vadd.f32 %v1252_v18, %v1190_v33 }
 0x1cd   : > { %v1300_v12 = vmax.f32 %v1234_v60, 0.0  ;;  %v1301_v19 = vmax.f32 %v1253_v28, 0.0 }
 0x1d1   : > { %v1271_v45 = vpop.f32.mrf.mxu2  ;;  %v1290_v43 = vpop.f32.mrf.mxu3 }
 0x1d2   : > { %v1235_v20 = vpop.f32.mrf.mxu0  ;;  %v1254_v42 = vpop.f32.mrf.mxu1  ;;  %v1272_v36 = vadd.f32 %v1271_v45, %v1190_v33  ;;  %v1291_v2 = vadd.f32 %v1290_v43, %v1190_v33 }
 0x1d3   : > { %v1236_v34 = vadd.f32 %v1235_v20, %v1195_v59  ;;  %v1255_v49 = vadd.f32 %v1254_v42, %v1195_v59 }
 0x1d4   : > { %v1302_v46 = vmax.f32 %v1272_v36, 0.0  ;;  %v1303_v63 = vmax.f32 %v1291_v2, 0.0 }
 0x1d5   : > { %v1304_v0 = vmax.f32 %v1236_v34, 0.0  ;;  %v1305_v26 = vmax.f32 %v1255_v49, 0.0 }
 0x1d7   : > { %v1317_v32 = vpack.c.bf16 %v1304_v0, %v1300_v12  ;;  %v1318_v40 = vpack.c.bf16 %v1305_v26, %v1301_v19 }
 0x1d9   : > { %v1273_v44 = vpop.f32.mrf.mxu2  ;;  %v1292_v53 = vpop.f32.mrf.mxu3 }
 0x1da   : > { %v1238_v22 = vpop.f32.mrf.mxu0  ;;  %v1257_v23 = vpop.f32.mrf.mxu1  ;;  %v1274_v13 = vadd.f32 %v1273_v44, %v1195_v59  ;;  %v1293_v51 = vadd.f32 %v1292_v53, %v1195_v59 }
 0x1db   : > { %v1239_v57 = vadd.f32 %v1238_v22, %v1200_v27  ;;  %v1258_v4 = vadd.f32 %v1257_v23, %v1200_v27 }
 0x1dc   : > { %v1306_v9 = vmax.f32 %v1274_v13, 0.0  ;;  %v1307_v3 = vmax.f32 %v1293_v51, 0.0 }
 0x1dd   : > { %v1308_v29 = vmax.f32 %v1239_v57, 0.0  ;;  %v1309_v35 = vmax.f32 %v1258_v4, 0.0 }
 0x1de   : > { %v1319_v14 = vpack.c.bf16 %v1306_v9, %v1302_v46  ;;  %v1320_v15 = vpack.c.bf16 %v1307_v3, %v1303_v63  ;;  %v1478_v46 = vlaneseq }
 0x1e1   : > { %v1276_v62 = vpop.f32.mrf.mxu2  ;;  %v1295_v30 = vpop.f32.mrf.mxu3 }
 0x1e2   : > { %v1240_v31 = vpop.f32.mrf.mxu0  ;;  %v1259_v1 = vpop.f32.mrf.mxu1  ;;  %v1277_v16 = vadd.f32 %v1276_v62, %v1200_v27  ;;  %v1296_v47 = vadd.f32 %v1295_v30, %v1200_v27 }
 0x1e3   : > { %v1241_v52 = vadd.f32 %v1240_v31, %v1205_v24  ;;  %v1260_v54 = vadd.f32 %v1259_v1, %v1205_v24 }
 0x1e4   : > { %v1310_v7 = vmax.f32 %v1277_v16, 0.0  ;;  %v1311_v8 = vmax.f32 %v1296_v47, 0.0 }
 0x1e5   : > { %v1312_v25 = vmax.f32 %v1241_v52, 0.0  ;;  %v1313_v10 = vmax.f32 %v1260_v54, 0.0 }
 0x1e7   : > { %v1321_v5 = vpack.c.bf16 %v1312_v25, %v1308_v29  ;;  %v1322_v48 = vpack.c.bf16 %v1313_v10, %v1309_v35 }
 0x1e9   : > { %v1278_v41 = vpop.f32.mrf.mxu2  ;;  %v1297_v6 = vpop.f32.mrf.mxu3  ;;  %1342 = vmatpush.bf16.msra.mxu0 %v1321_v5  ;;  %1355 = vmatpush.bf16.msra.mxu1 %v1322_v48 }
 0x1ea   : > { %v1279_v58 = vadd.f32 %v1278_v41, %v1205_v24  ;;  %v1298_v17 = vadd.f32 %v1297_v6, %v1205_v24 }
 0x1ec   : > { %v1314_v61 = vmax.f32 %v1279_v58, 0.0  ;;  %v1315_v50 = vmax.f32 %v1298_v17, 0.0 }
 0x1ed   : > { %1343 = vmatpush.bf16.msra.mxu0 %v1317_v32  ;;  %1356 = vmatpush.bf16.msra.mxu1 %v1318_v40 }
 0x1ee   : > { %v1323_v38 = vpack.c.bf16 %v1314_v61, %v1310_v7  ;;  %v1324_v39 = vpack.c.bf16 %v1315_v50, %v1311_v8 }
 0x1f0   : > { %1368 = vmatpush.bf16.msra.mxu2 %v1323_v38  ;;  %1381 = vmatpush.bf16.msra.mxu3 %v1324_v39 }
 0x1f1   : > { %1646 = vmatmul.msk.bf16.vlgmr.msra.gmra.mxu0 %vm1332_vm7, %v1316_v21  ;;  %1647 = vmatmul.msk.bf16.vlgmr.msra.gmra.mxu1 %vm1332_vm7, %v1316_v21 }
 0x1f4   : > { %1369 = vmatpush.bf16.msra.mxu2 %v1319_v14  ;;  %1382 = vmatpush.bf16.msra.mxu3 %v1320_v15 }
 0x1f7   : > { %1648 = vmatmul.msk.bf16.vlgmr.msra.gmra.mxu2 %vm1332_vm7, %v1316_v21  ;;  %1649 = vmatmul.msk.bf16.vlgmr.msra.gmra.mxu3 %vm1332_vm7, %v1316_v21 }
 0x26e   : > { %v1345_v56 = vpop.f32.mrf.mxu0  ;;  %v1358_v37 = vpop.f32.mrf.mxu1 }
 0x26f   : > { %v1346_v18 = vadd.f32 %v1345_v56, %v1331_v11  ;;  %v1359_v45 = vadd.f32 %v1358_v37, %v1331_v11 }
 0x271   : > { %v1650_v43 = vmul.f32 -1.442695, %v1346_v18  ;;  %v1651_v20 = vmul.f32 -1.442695, %v1359_v45 }
 0x273   : > { %1757 = vpow2.f32 %v1650_v43 }
 0x274   : > { %1759 = vpow2.f32 %v1651_v20 }
 0x276   : > { %v1360_v42 = vpop.f32.mrf.mxu1  ;;  %v1347_v27 = vpop.f32.mrf.mxu0 }
 0x279   : > { %v1758_v44 = vpop.eup %1757 }
 0x27a   : > { %v1760_v53 = vpop.eup %1759  ;;  %v2948_v22 = vadd.f32 1.0, %v1758_v44  ;;  %v1371_v23 = vpop.f32.mrf.mxu2 }
 0x27b   : > { %v1384_v59 = vpop.f32.mrf.mxu3  ;;  %v1401_v24 = vadd.f32 1.0, %v1760_v53  ;;  %v1372_v57 = vadd.f32 %v1371_v23, %v1331_v11 }
 0x27c   : > { %v1385_v4 = vadd.f32 %v1384_v59, %v1331_v11  ;;  %vm1409_vm9 = vweird.f32 %v2948_v22  ;;  %v1413_v41 = vand.u32 2147483647, %v2948_v22  ;;  %v1415_v9 = vand.u32 2147483648, %v2948_v22 }
 0x27d   : > { %1761 = vrcp.f32 %v1401_v24  ;;  %v1652_v62 = vmul.f32 -1.442695, %v1372_v57  ;;  %v1430_v0 = vand.u32 2147483648, %v1401_v24  ;;  %vm1424_vm10 = vweird.f32 %v1401_v24 }
 0x27e   : > { %1763 = vrcp.f32 %v2948_v22  ;;  %v1653_v30 = vmul.f32 -1.442695, %v1385_v4  ;;  %v1428_v12 = vand.u32 2147483647, %v1401_v24  ;;  %v1416_v37 = vor.u32 1.1754944e-38, %v1415_v9 }
 0x27f   : > { %1765 = vpow2.f32 %v1652_v62  ;;  %v1431_v13 = vor.u32 1.1754944e-38, %v1430_v0 }
 0x280   : > { %1767 = vpow2.f32 %v1653_v30  ;;  %vm1429_vm15 = vcmp.eq.f32.partialorder %v1428_v12, 8.507059e+37 }
 0x282   : > { %v1373_v31 = vpop.f32.mrf.mxu2 }
 0x283   : > { %v1386_v1 = vpop.f32.mrf.mxu3  ;;  %v1762_v33 = vpop.eup %1761 }
 0x284   : > { %v2951_v34 = vpop.eup %1763  ;;  %v1420_v49 = vmul.f32 %v1762_v33, %v1401_v24  ;;  %vm1425_vm8 = vweird.f32 %v1762_v33 }
 0x285   : > { %v1766_v52 = vpop.eup %1765  ;;  %v1405_v60 = vmul.f32 %v2951_v34, %v2948_v22  ;;  %vm1410_vm11 = vweird.f32 %v2951_v34  ;;  %vm2959_vm12 = vmor %vm1424_vm10, %vm1425_vm8  ;;  %vm1473_vm8 = vcmask 1042434   ;;  %vm1475_vm10 = vcmask 1041408  }
 0x286   : > { %v1768_v54 = vpop.eup %1767  ;;  %v1421_v28 = vsub.f32 1.0, %v1420_v49  ;;  %v1402_v29 = vadd.f32 1.0, %v1766_v52  ;;  %vm2972_vm1 = vmor %vm1409_vm9, %vm1410_vm11  ;;  %vm1414_vm9 = vcmp.eq.f32.partialorder %v1413_v41, 8.507059e+37  ;;  %vm1480_vm11 = vcmp.lt.s32.totalorder %v1478_v46, 512 }
 0x287   : > { %v1403_v35 = vadd.f32 1.0, %v1768_v54  ;;  %v1406_v25 = vsub.f32 1.0, %v1405_v60 }
 0x288   : > { %1769 = vrcp.f32 %v1402_v29  ;;  %v1422_v10 = vmul.f32 %v1762_v33, %v1421_v28  ;;  %v1445_v17 = vand.u32 2147483648, %v1402_v29  ;;  %v1443_v40 = vand.u32 2147483647, %v1402_v29 }
 0x289   : > { %1771 = vrcp.f32 %v1403_v35  ;;  %v1407_v5 = vmul.f32 %v2951_v34, %v1406_v25  ;;  %v1460_v7 = vand.u32 2147483648, %v1403_v35  ;;  %v1458_v61 = vand.u32 2147483647, %v1403_v35 }
 0x28a   : > { %v1423_v48 = vadd.f32 %v1762_v33, %v1422_v10  ;;  %vm1439_vm2 = vweird.f32 %v1402_v29  ;;  %v1446_v39 = vor.u32 1.1754944e-38, %v1445_v17  ;;  %vm1454_vm4 = vweird.f32 %v1403_v35 }
 0x28b   : > { %v1408_v58 = vadd.f32 %v2951_v34, %v1407_v5  ;;  %vm1444_vm5 = vcmp.eq.f32.partialorder %v1443_v40, 8.507059e+37  ;;  %v1461_v63 = vor.u32 1.1754944e-38, %v1460_v7  ;;  %vm1459_vm7 = vcmp.eq.f32.partialorder %v1458_v61, 8.507059e+37 }
 0x28c   : > { %v1427_v2 = vsel %vm2959_vm12, %v1762_v33, %v1423_v48 }
 0x28d   : > { %v1432_v38 = vsel %vm1429_vm15, %v1431_v13, %v1427_v2  ;;  %v1412_v14 = vsel %vm2972_vm1, %v2951_v34, %v1408_v58 }
 0x28e   : > { %v1770_v26 = vpop.eup %1769  ;;  %v1468_v56 = vrot.slane %v1432_v38, 7  ;;  %v1417_v20 = vsel %vm1414_vm9, %v1416_v37, %v1412_v14 }
 0x28f   : > { %v1772_v16 = vpop.eup %1771  ;;  %v1435_v47 = vmul.f32 %v1770_v26, %v1402_v29  ;;  %vm1440_vm14 = vweird.f32 %v1770_v26 }
 0x290   : > { %v1450_v19 = vmul.f32 %v1772_v16, %v1403_v35  ;;  %vm1455_vm0 = vweird.f32 %v1772_v16  ;;  %vm1441_vm3 = vmor %vm1439_vm2, %vm1440_vm14  ;;  %v1472_v42 = vsel %vm1471_vm13, %v1417_v20, %v1468_v56 }
 0x291   : > { %v1436_v51 = vsub.f32 1.0, %v1435_v47  ;;  %vm1456_vm6 = vmor %vm1454_vm4, %vm1455_vm0 }
 0x292   : > { %v1451_v36 = vsub.f32 1.0, %v1450_v19 }
 0x293   : > { %v1437_v32 = vmul.f32 %v1770_v26, %v1436_v51 }
 0x294   : > { %v1452_v8 = vmul.f32 %v1772_v16, %v1451_v36 }
 0x295   : > { %v1438_v3 = vadd.f32 %v1770_v26, %v1437_v32 }
 0x296   : > { %v1453_v21 = vadd.f32 %v1772_v16, %v1452_v8 }
 0x297   : > { %v1442_v15 = vsel %vm1441_vm3, %v1770_v26, %v1438_v3 }
 0x298   : > { %v1447_v55 = vsel %vm1444_vm5, %v1446_v39, %v1442_v15  ;;  %v1457_v11 = vsel %vm1456_vm6, %v1772_v16, %v1453_v21 }
 0x299   : > { %v1462_v18 = vsel %vm1459_vm7, %v1461_v63, %v1457_v11  ;;  %v1469_v45 = vrot.slane %v1447_v55, 6 }
 0x29a   : > { %v1470_v43 = vrot.slane %v1462_v18, 5 }
 0x29c   : > { %v1474_v27 = vsel %vm1473_vm8, %v1469_v45, %v1470_v43 }
 0x29d   : > { %v1476_v44 = vsel %vm1475_vm10, %v1472_v42, %v1474_v27 }
 0x29e   : > { %1482 = vst.msk [vmem:[%s325_s11] sm:$0xf] %vm1480_vm11, %v1476_v44 }
 0x29f   : > { %1830 = shalt.err (!%p1827_p4)
}
 0x2a0   : > { %1667 = dma.vmem_to_hbm [thread:$0]  (%p1974_p10), %s1497_s13, 64, %s1499_s17, %s1484_s14  }
 0x2a1 PF: > { %p1678_p5 = scmp.ge.s32.totalorder %s1869_s10, 2  ;;  %s1510_s20 = sand.u32 1, %s1857_s29  }
 0x2a2   : > { %s1511_s27 = scalar_lea.sflag [#allocation5], %s1510_s20 }
 0x2a3   : > { %p1674_p7 = pnand %p1678_p5, %p1978_p11 }
 0x2a5   : > { %p1675_p8 = pneg %p1674_p7 }
 0x2a7   : > { %1852 = dma.done.wait (%p1675_p8), %s1511_s27, 64  }
 0x2a8   : > { %1854 = vsyncadd (%p1675_p8), %s1511_s27, 4294967232  ;;  %s3174_s7 = sld [smem:[#allocation9_spill]]  ;;  %p23_p9 = scmp.ge.s32.totalorder %s1950_s12, 7  }
 0x2a9   : > { %s3175_s29 = smov %s1861_s30  ;;  %s3176_s30 = smov %s1865_s9 }
 0x2aa   : > { %s3178_s10 = smov %s1950_s12  ;;  %25 = sbr.rel (!%p23_p9) target bundleno = 8 (0x8), region = 97 }
 0x2ae   : > { %s3177_s9 = smov %s3174_s7 }
 0x2af   :  { %1517 = vsyncpa [#allocation4], 1 }
 0x2b0   :  { %1519 = vsyncpa [#allocation4 + $0x1], 1 }
 0x2b1   :  { %1520 = vsyncpa [#allocation5], 1 }
 0x2b2   :  { %1522 = vsyncpa [#allocation5 + $0x1], 1 }

</bundles_post_ra>
